<compile_context>
chip_gen: v7x
topology: tpu7x:2x2x1
jax: 0.10.0
libtpu: 0.0.40
codegen_flags: <defaults>
</compile_context>

<pallas_src>
import math

import jax
import jax.numpy as jnp
from jax import lax
from jax.experimental import pallas as pl
from jax.experimental.pallas import tpu as pltpu


# ----------------------------- model config ---------------------------------
DIM = 64
N_HEADS = 4
HEAD_DIM = DIM // N_HEADS          # 16
HALF = HEAD_DIM // 2               # 8
MULTIPLE_OF = 32
NORM_EPS = 1e-5
BATCH = 2
SEQ = 16


def ffn_hidden_dim(dim: int, multiple_of: int) -> int:
    hidden = 4 * dim
    hidden = int(2 * hidden / 3)
    return multiple_of * ((hidden + multiple_of - 1) // multiple_of)


HIDDEN_DIM = ffn_hidden_dim(DIM, MULTIPLE_OF)  # 192 for DIM=64, multiple_of=32


# ----------------------------- fused block kernel ----------------------------
def _rms(v, w):
    ms = jnp.mean(v * v, axis=-1, keepdims=True)
    return (v * lax.rsqrt(ms + NORM_EPS)) * w


def _block_kernel(x_ref, wqkv_ref, wo_ref, w13_ref, w2_ref,
                  attn_nw_ref, ffn_nw_ref, rope_ref, o_ref):
    # x_ref: (1, S, D) for the current batch element.
    x = x_ref[0]                                                     # (S, D)

    # ---- attention branch --------------------------------------------------
    xn = _rms(x, attn_nw_ref[...])
    qkv = jnp.dot(xn, wqkv_ref[...], preferred_element_type=jnp.float32)  # (S, 3D)
    q = qkv[:, :DIM]
    k = qkv[:, DIM:2 * DIM]
    v = qkv[:, 2 * DIM:]

    # RoPE for all heads at once.  q/k are in GLOBAL half-split layout:
    # columns [0, D/2) are the "real" parts of every head, [D/2, D) the
    # "imag" parts, so the rotation is two (S, D/2) elementwise passes.
    half_d = DIM // 2
    cos_t = rope_ref[:, :half_d]                                     # (S, D/2)
    sin_t = rope_ref[:, half_d:]                                     # (S, D/2)

    def rope(t):
        re = t[:, :half_d]
        im = t[:, half_d:]
        return re * cos_t - im * sin_t, re * sin_t + im * cos_t

    q_re, q_im = rope(q)
    k_re, k_im = rope(k)

    scale = 1.0 / math.sqrt(HEAD_DIM)
    dn = (((1,), (1,)), ((), ()))   # contract last dims: (S,d)x(S,d) -> (S,S)

    # One K=HEAD_DIM dot per head; stack the per-head score tiles along
    # sublanes into a single (H*S, S) slab so softmax runs once.
    score_blocks = []
    for h in range(N_HEADS):                       # static loop, stays fused
        c0, c1 = h * HALF, (h + 1) * HALF
        qh = jnp.concatenate([q_re[:, c0:c1], q_im[:, c0:c1]], axis=1)  # (S, Dh)
        kh = jnp.concatenate([k_re[:, c0:c1], k_im[:, c0:c1]], axis=1)  # (S, Dh)
        score_blocks.append(
            lax.dot_general(qh, kh, dn, preferred_element_type=jnp.float32))
    scores = jnp.concatenate(score_blocks, axis=0) * scale           # (H*S, S)

    # Causal mask, generated in-kernel (no HBM mask input), broadcast across
    # the head-stacked rows.
    # TODO(synk): an arbitrary user-supplied mask would need an extra VMEM
    # input; the module's typical causal mask is built here.
    row3 = lax.broadcasted_iota(jnp.int32, (N_HEADS, SEQ, SEQ), 1)
    col3 = lax.broadcasted_iota(jnp.int32, (N_HEADS, SEQ, SEQ), 2)
    causal = (col3 <= row3).reshape(N_HEADS * SEQ, SEQ)
    scores = jnp.where(causal, scores, -jnp.inf)

    # Batched softmax over the (H*S, S) slab.
    m = jnp.max(scores, axis=-1, keepdims=True)
    p = jnp.exp(scores - m)
    denom = jnp.sum(p, axis=-1, keepdims=True)
    attn = p * pl.reciprocal(denom, approx=True)                     # (H*S, S)

    # Per-head PV; outputs concatenated as values (no scratch) into wo.
    head_outs = []
    for h in range(N_HEADS):
        attn_h = attn[h * SEQ:(h + 1) * SEQ, :]                      # (S, S)
        vh = v[:, h * HEAD_DIM:(h + 1) * HEAD_DIM]                   # (S, Dh)
        head_outs.append(jnp.dot(attn_h, vh,
                                 preferred_element_type=jnp.float32))
    attn_out = jnp.concatenate(head_outs, axis=1)                    # (S, D)

    h_res = x + jnp.dot(attn_out, wo_ref[...],
                        preferred_element_type=jnp.float32)

    # ---- feed-forward branch (SwiGLU, w1|w3 fused) --------------------------
    hn = _rms(h_res, ffn_nw_ref[...])
    h13 = jnp.dot(hn, w13_ref[...], preferred_element_type=jnp.float32)  # (S, 2*HID)
    h1 = h13[:, :HIDDEN_DIM]
    h3 = h13[:, HIDDEN_DIM:]
    ff = jnp.dot((h1 * jax.nn.sigmoid(h1)) * h3, w2_ref[...],
                 preferred_element_type=jnp.float32)

    o_ref[0] = h_res + ff


# ----------------------------- one-time weight prep --------------------------
def prepare_block_params(params, freqs_cis):
    """Hoisted out of the per-forward path: fuse / permute weights and build
    the merged RoPE table once."""
    # Global half-split permutation of wq/wk output columns: target column
    # h*HALF+j (re block) <- source h*HEAD_DIM+2j ; target D/2+h*HALF+j (im
    # block) <- source h*HEAD_DIM+2j+1.  QK^T is invariant to this consistent
    # permutation of Q and K.
    perm = ([h * HEAD_DIM + 2 * j for h in range(N_HEADS) for j in range(HALF)]
            + [h * HEAD_DIM + 2 * j + 1 for h in range(N_HEADS) for j in range(HALF)])
    perm = jnp.array(perm, dtype=jnp.int32)

    wq_p = params["wq"][:, perm]
    wk_p = params["wk"][:, perm]
    wqkv = jnp.concatenate([wq_p, wk_p, params["wv"]], axis=1)       # (D, 3D)
    w13 = jnp.concatenate([params["w1"], params["w3"]], axis=1)      # (D, 2*HID)

    cos = jnp.real(freqs_cis).astype(jnp.float32)                    # (S, HALF)
    sin = jnp.imag(freqs_cis).astype(jnp.float32)                    # (S, HALF)
    cos_t = jnp.tile(cos, (1, N_HEADS))                              # (S, D/2)
    sin_t = jnp.tile(sin, (1, N_HEADS))                              # (S, D/2)
    rope = jnp.concatenate([cos_t, sin_t], axis=1)                   # (S, D)

    return {
        "wqkv": wqkv,
        "wo": params["wo"],
        "w13": w13,
        "w2": params["w2"],
        "attn_nw": params["attn_norm_w"].reshape(1, DIM),
        "ffn_nw": params["ffn_norm_w"].reshape(1, DIM),
        "rope": rope,
    }


# ----------------------------- forward wrapper --------------------------------
def transformer_block_forward(x, prep):
    B, S, D = x.shape

    def full(shape):
        return pl.BlockSpec(shape, lambda b, _n=len(shape): (0,) * _n)

    return pl.pallas_call(
        _block_kernel,
        out_shape=jax.ShapeDtypeStruct((B, S, D), jnp.float32),
        grid=(B,),
        in_specs=[
            pl.BlockSpec((1, S, D), lambda b: (b, 0, 0)),   # x
            full(prep["wqkv"].shape),                       # fused qkv weight
            full(prep["wo"].shape),                         # wo
            full(prep["w13"].shape),                        # fused w1|w3
            full(prep["w2"].shape),                         # w2
            full(prep["attn_nw"].shape),                    # attn norm weight
            full(prep["ffn_nw"].shape),                     # ffn norm weight
            full(prep["rope"].shape),                       # merged cos|sin table
        ],
        out_specs=pl.BlockSpec((1, S, D), lambda b: (b, 0, 0)),
        compiler_params=pltpu.CompilerParams(
            dimension_semantics=("parallel",)),
    )(x, prep["wqkv"], prep["wo"], prep["w13"], prep["w2"],
      prep["attn_nw"], prep["ffn_nw"], prep["rope"])


# ----------------------------- RoPE helpers (reference path) -----------------
def precompute_freqs_cis(dim, end, theta=10000.0):
    freqs = 1.0 / (theta ** (jnp.arange(0, dim, 2)[: dim // 2].astype(jnp.float32) / dim))
    t = jnp.arange(end, dtype=jnp.float32)
    freqs = jnp.outer(t, freqs)
    return jnp.exp(1j * freqs.astype(jnp.complex64))  # (end, dim//2) complex64


def apply_rotary_emb(xq, xk, freqs_cis):
    def rot(xx):
        shp = xx.shape
        xf = xx.astype(jnp.float32).reshape(*shp[:-1], -1, 2)
        xc = jax.lax.complex(xf[..., 0], xf[..., 1])
        fc = freqs_cis.reshape(1, xc.shape[1], 1, xc.shape[-1])
        xo = xc * fc
        out = jnp.stack([jnp.real(xo), jnp.imag(xo)], axis=-1).reshape(shp)
        return out.astype(xx.dtype)
    return rot(xq), rot(xk)


# ----------------------------- pure-JAX reference -----------------------------
def ref_forward(x, params, freqs_cis, mask):
    B, S, D = x.shape
    H, Dh = N_HEADS, HEAD_DIM

    def rms(xx, w):
        ms = jnp.mean(xx * xx, axis=-1, keepdims=True)
        return xx * jax.lax.rsqrt(ms + NORM_EPS) * w

    xn = rms(x, params["attn_norm_w"])
    xq = (xn @ params["wq"]).reshape(B, S, H, Dh)
    xk = (xn @ params["wk"]).reshape(B, S, H, Dh)
    xv = (xn @ params["wv"]).reshape(B, S, H, Dh)
    xq, xk = apply_rotary_emb(xq, xk, freqs_cis)
    q = jnp.transpose(xq, (0, 2, 1, 3))
    k = jnp.transpose(xk, (0, 2, 1, 3))
    v = jnp.transpose(xv, (0, 2, 1, 3))
    scores = jnp.einsum("bhqd,bhkd->bhqk", q, k) / math.sqrt(Dh) + mask
    attn = jax.nn.softmax(scores, axis=-1)
    out = jnp.einsum("bhqk,bhkd->bhqd", attn, v)
    out = jnp.transpose(out, (0, 2, 1, 3)).reshape(B, S, D)
    h = x + out @ params["wo"]
    hn = rms(h, params["ffn_norm_w"])
    h1 = hn @ params["w1"]
    h3 = hn @ params["w3"]
    ff = (h1 * jax.nn.sigmoid(h1) * h3) @ params["w2"]
    return h + ff


# ----------------------------- main ------------------------------------------
if __name__ == "__main__":
    key = jax.random.PRNGKey(0)
    keys = jax.random.split(key, 10)

    # Deterministic synthetic parameters (stored transposed, (in, out), so the
    # kernel does x @ W like torch's x @ weight.T).
    params = {
        "wq": jax.random.normal(keys[0], (DIM, DIM), jnp.float32) * 0.05,
        "wk": jax.random.normal(keys[1], (DIM, DIM), jnp.float32) * 0.05,
        "wv": jax.random.normal(keys[2], (DIM, DIM), jnp.float32) * 0.05,
        "wo": jax.random.normal(keys[3], (DIM, DIM), jnp.float32) * 0.05,
        "w1": jax.random.normal(keys[4], (DIM, HIDDEN_DIM), jnp.float32) * 0.05,
        "w2": jax.random.normal(keys[5], (HIDDEN_DIM, DIM), jnp.float32) * 0.05,
        "w3": jax.random.normal(keys[6], (DIM, HIDDEN_DIM), jnp.float32) * 0.05,
        "attn_norm_w": 1.0 + 0.01 * jax.random.normal(keys[7], (DIM,), jnp.float32),
        "ffn_norm_w": 1.0 + 0.01 * jax.random.normal(keys[8], (DIM,), jnp.float32),
    }

    x = jax.random.normal(keys[9], (BATCH, SEQ, DIM), jnp.float32)
    freqs_cis = precompute_freqs_cis(HEAD_DIM, SEQ)

    # One-time weight prep (hoisted out of the per-forward path).
    prep = prepare_block_params(params, freqs_cis)
    prep = jax.tree_util.tree_map(jax.block_until_ready, prep)

    out = transformer_block_forward(x, prep)
    out = jax.block_until_ready(out)

    # causal mask for the reference (same semantics as the in-kernel mask)
    mask = jnp.triu(jnp.full((SEQ, SEQ), float("-inf"), jnp.float32), k=1)
    ref = jax.block_until_ready(ref_forward(x, params, freqs_cis, mask))

    assert out.shape == (BATCH, SEQ, DIM)
    assert jnp.allclose(out, ref, rtol=1e-3, atol=1e-3), "mismatch vs JAX reference"

    print("KERNEL_OK")
</pallas_src>

<mosaic_0001>
module attributes {stable_mosaic.version = 11 : i64} {
  func.func @_block_kernel(%arg0: i32, %arg1: memref<1x16x64xf32, #tpu.memory_space<vmem>>, %arg2: memref<64x192xf32, #tpu.memory_space<vmem>>, %arg3: memref<64x64xf32, #tpu.memory_space<vmem>>, %arg4: memref<64x384xf32, #tpu.memory_space<vmem>>, %arg5: memref<192x64xf32, #tpu.memory_space<vmem>>, %arg6: memref<1x64xf32, #tpu.memory_space<vmem>>, %arg7: memref<1x64xf32, #tpu.memory_space<vmem>>, %arg8: memref<16x64xf32, #tpu.memory_space<vmem>>, %arg9: memref<1x16x64xf32, #tpu.memory_space<vmem>>) attributes {dimension_semantics = [#tpu.dimension_semantics<parallel>], iteration_bounds = array<i64: 2>, scalar_prefetch = 0 : i64, scratch_operands = 0 : i64, tpu.core_type = #tpu.core_type<tc>, window_params = [{transform_indices = @transform_0, window_bounds = array<i64: 1, 16, 64>}, {pipeline_mode = #tpu.pipeline_mode<synchronous>, transform_indices = @transform_1, window_bounds = array<i64: 64, 192>}, {pipeline_mode = #tpu.pipeline_mode<synchronous>, transform_indices = @transform_2, window_bounds = array<i64: 64, 64>}, {pipeline_mode = #tpu.pipeline_mode<synchronous>, transform_indices = @transform_3, window_bounds = array<i64: 64, 384>}, {pipeline_mode = #tpu.pipeline_mode<synchronous>, transform_indices = @transform_4, window_bounds = array<i64: 192, 64>}, {pipeline_mode = #tpu.pipeline_mode<synchronous>, transform_indices = @transform_5, window_bounds = array<i64: 1, 64>}, {pipeline_mode = #tpu.pipeline_mode<synchronous>, transform_indices = @transform_6, window_bounds = array<i64: 1, 64>}, {pipeline_mode = #tpu.pipeline_mode<synchronous>, transform_indices = @transform_7, window_bounds = array<i64: 16, 64>}, {transform_indices = @transform_8, window_bounds = array<i64: 1, 16, 64>}]} {
    %c0 = arith.constant 0 : index
    %c0_0 = arith.constant 0 : index
    %c0_1 = arith.constant 0 : index
    %0 = vector.load %arg1[%c0, %c0_0, %c0_1] : memref<1x16x64xf32, #tpu.memory_space<vmem>>, vector<1x16x64xf32>
    %1 = vector.shape_cast %0 : vector<1x16x64xf32> to vector<16x64xf32>
    %c0_2 = arith.constant 0 : index
    %c0_3 = arith.constant 0 : index
    %2 = vector.load %arg6[%c0_2, %c0_3] : memref<1x64xf32, #tpu.memory_space<vmem>>, vector<1x64xf32>
    %3 = arith.mulf %1, %1 : vector<16x64xf32>
    %cst = arith.constant dense<0.000000e+00> : vector<16xf32>
    %4 = vector.multi_reduction <add>, %3, %cst [1] : vector<16x64xf32> to vector<16xf32>
    %5 = vector.shape_cast %4 : vector<16xf32> to vector<16x1xf32>
    %cst_4 = arith.constant 6.400000e+01 : f32
    %6 = vector.broadcast %cst_4 : f32 to vector<16x1xf32>
    %7 = arith.divf %5, %6 : vector<16x1xf32>
    %cst_5 = arith.constant 9.99999974E-6 : f32
    %8 = vector.broadcast %cst_5 : f32 to vector<16x1xf32>
    %9 = arith.addf %7, %8 : vector<16x1xf32>
    %10 = math.rsqrt %9 : vector<16x1xf32>
    %11 = vector.broadcast %10 : vector<16x1xf32> to vector<16x64xf32>
    %12 = arith.mulf %1, %11 : vector<16x64xf32>
    %13 = vector.broadcast %2 : vector<1x64xf32> to vector<16x64xf32>
    %14 = arith.mulf %12, %13 : vector<16x64xf32>
    %c0_6 = arith.constant 0 : index
    %c0_7 = arith.constant 0 : index
    %15 = vector.load %arg2[%c0_6, %c0_7] : memref<64x192xf32, #tpu.memory_space<vmem>>, vector<64x192xf32>
    %cst_8 = arith.constant dense<0.000000e+00> : vector<16x192xf32>
    %16 = tpu.matmul %14, %15, %cst_8 {dimension_numbers = #tpu.dot_dimension_numbers<[1], [0], [0], [1], [0, 0, 1, 1], [], []>} : vector<16x64xf32>, vector<64x192xf32>, vector<16x192xf32> -> vector<16x192xf32>
    %17 = vector.extract_strided_slice %16 {offsets = [0, 0], sizes = [16, 64], strides = [1, 1]} : vector<16x192xf32> to vector<16x64xf32>
    %18 = vector.extract_strided_slice %16 {offsets = [0, 64], sizes = [16, 64], strides = [1, 1]} : vector<16x192xf32> to vector<16x64xf32>
    %19 = vector.extract_strided_slice %16 {offsets = [0, 128], sizes = [16, 64], strides = [1, 1]} : vector<16x192xf32> to vector<16x64xf32>
    %c0_9 = arith.constant 0 : index
    %c0_10 = arith.constant 0 : index
    %20 = vector.load %arg8[%c0_9, %c0_10] : memref<16x64xf32, #tpu.memory_space<vmem>>, vector<16x32xf32>
    %c0_11 = arith.constant 0 : index
    %c32 = arith.constant 32 : index
    %21 = vector.load %arg8[%c0_11, %c32] : memref<16x64xf32, #tpu.memory_space<vmem>>, vector<16x32xf32>
    %22 = vector.extract_strided_slice %17 {offsets = [0, 0], sizes = [16, 32], strides = [1, 1]} : vector<16x64xf32> to vector<16x32xf32>
    %23 = vector.extract_strided_slice %17 {offsets = [0, 32], sizes = [16, 32], strides = [1, 1]} : vector<16x64xf32> to vector<16x32xf32>
    %24 = arith.mulf %22, %20 : vector<16x32xf32>
    %25 = arith.mulf %23, %21 : vector<16x32xf32>
    %26 = arith.subf %24, %25 : vector<16x32xf32>
    %27 = arith.mulf %22, %21 : vector<16x32xf32>
    %28 = arith.mulf %23, %20 : vector<16x32xf32>
    %29 = arith.addf %27, %28 : vector<16x32xf32>
    %30 = vector.extract_strided_slice %18 {offsets = [0, 0], sizes = [16, 32], strides = [1, 1]} : vector<16x64xf32> to vector<16x32xf32>
    %31 = vector.extract_strided_slice %18 {offsets = [0, 32], sizes = [16, 32], strides = [1, 1]} : vector<16x64xf32> to vector<16x32xf32>
    %32 = arith.mulf %30, %20 : vector<16x32xf32>
    %33 = arith.mulf %31, %21 : vector<16x32xf32>
    %34 = arith.subf %32, %33 : vector<16x32xf32>
    %35 = arith.mulf %30, %21 : vector<16x32xf32>
    %36 = arith.mulf %31, %20 : vector<16x32xf32>
    %37 = arith.addf %35, %36 : vector<16x32xf32>
    %38 = vector.extract_strided_slice %26 {offsets = [0, 0], sizes = [16, 8], strides = [1, 1]} : vector<16x32xf32> to vector<16x8xf32>
    %39 = vector.extract_strided_slice %29 {offsets = [0, 0], sizes = [16, 8], strides = [1, 1]} : vector<16x32xf32> to vector<16x8xf32>
    %40 = tpu.concatenate %38, %39 in 1 : vector<16x8xf32>, vector<16x8xf32> -> vector<16x16xf32>
    %41 = vector.extract_strided_slice %34 {offsets = [0, 0], sizes = [16, 8], strides = [1, 1]} : vector<16x32xf32> to vector<16x8xf32>
    %42 = vector.extract_strided_slice %37 {offsets = [0, 0], sizes = [16, 8], strides = [1, 1]} : vector<16x32xf32> to vector<16x8xf32>
    %43 = tpu.concatenate %41, %42 in 1 : vector<16x8xf32>, vector<16x8xf32> -> vector<16x16xf32>
    %cst_12 = arith.constant dense<0.000000e+00> : vector<16x16xf32>
    %44 = tpu.matmul %40, %43, %cst_12 {dimension_numbers = #tpu.dot_dimension_numbers<[1], [1], [0], [0], [0, 0, 1, 0], [], []>} : vector<16x16xf32>, vector<16x16xf32>, vector<16x16xf32> -> vector<16x16xf32>
    %45 = vector.extract_strided_slice %26 {offsets = [0, 8], sizes = [16, 8], strides = [1, 1]} : vector<16x32xf32> to vector<16x8xf32>
    %46 = vector.extract_strided_slice %29 {offsets = [0, 8], sizes = [16, 8], strides = [1, 1]} : vector<16x32xf32> to vector<16x8xf32>
    %47 = tpu.concatenate %45, %46 in 1 : vector<16x8xf32>, vector<16x8xf32> -> vector<16x16xf32>
    %48 = vector.extract_strided_slice %34 {offsets = [0, 8], sizes = [16, 8], strides = [1, 1]} : vector<16x32xf32> to vector<16x8xf32>
    %49 = vector.extract_strided_slice %37 {offsets = [0, 8], sizes = [16, 8], strides = [1, 1]} : vector<16x32xf32> to vector<16x8xf32>
    %50 = tpu.concatenate %48, %49 in 1 : vector<16x8xf32>, vector<16x8xf32> -> vector<16x16xf32>
    %cst_13 = arith.constant dense<0.000000e+00> : vector<16x16xf32>
    %51 = tpu.matmul %47, %50, %cst_13 {dimension_numbers = #tpu.dot_dimension_numbers<[1], [1], [0], [0], [0, 0, 1, 0], [], []>} : vector<16x16xf32>, vector<16x16xf32>, vector<16x16xf32> -> vector<16x16xf32>
    %52 = vector.extract_strided_slice %26 {offsets = [0, 16], sizes = [16, 8], strides = [1, 1]} : vector<16x32xf32> to vector<16x8xf32>
    %53 = vector.extract_strided_slice %29 {offsets = [0, 16], sizes = [16, 8], strides = [1, 1]} : vector<16x32xf32> to vector<16x8xf32>
    %54 = tpu.concatenate %52, %53 in 1 : vector<16x8xf32>, vector<16x8xf32> -> vector<16x16xf32>
    %55 = vector.extract_strided_slice %34 {offsets = [0, 16], sizes = [16, 8], strides = [1, 1]} : vector<16x32xf32> to vector<16x8xf32>
    %56 = vector.extract_strided_slice %37 {offsets = [0, 16], sizes = [16, 8], strides = [1, 1]} : vector<16x32xf32> to vector<16x8xf32>
    %57 = tpu.concatenate %55, %56 in 1 : vector<16x8xf32>, vector<16x8xf32> -> vector<16x16xf32>
    %cst_14 = arith.constant dense<0.000000e+00> : vector<16x16xf32>
    %58 = tpu.matmul %54, %57, %cst_14 {dimension_numbers = #tpu.dot_dimension_numbers<[1], [1], [0], [0], [0, 0, 1, 0], [], []>} : vector<16x16xf32>, vector<16x16xf32>, vector<16x16xf32> -> vector<16x16xf32>
    %59 = vector.extract_strided_slice %26 {offsets = [0, 24], sizes = [16, 8], strides = [1, 1]} : vector<16x32xf32> to vector<16x8xf32>
    %60 = vector.extract_strided_slice %29 {offsets = [0, 24], sizes = [16, 8], strides = [1, 1]} : vector<16x32xf32> to vector<16x8xf32>
    %61 = tpu.concatenate %59, %60 in 1 : vector<16x8xf32>, vector<16x8xf32> -> vector<16x16xf32>
    %62 = vector.extract_strided_slice %34 {offsets = [0, 24], sizes = [16, 8], strides = [1, 1]} : vector<16x32xf32> to vector<16x8xf32>
    %63 = vector.extract_strided_slice %37 {offsets = [0, 24], sizes = [16, 8], strides = [1, 1]} : vector<16x32xf32> to vector<16x8xf32>
    %64 = tpu.concatenate %62, %63 in 1 : vector<16x8xf32>, vector<16x8xf32> -> vector<16x16xf32>
    %cst_15 = arith.constant dense<0.000000e+00> : vector<16x16xf32>
    %65 = tpu.matmul %61, %64, %cst_15 {dimension_numbers = #tpu.dot_dimension_numbers<[1], [1], [0], [0], [0, 0, 1, 0], [], []>} : vector<16x16xf32>, vector<16x16xf32>, vector<16x16xf32> -> vector<16x16xf32>
    %66 = tpu.concatenate %44, %51, %58, %65 in 0 : vector<16x16xf32>, vector<16x16xf32>, vector<16x16xf32>, vector<16x16xf32> -> vector<64x16xf32>
    %cst_16 = arith.constant 2.500000e-01 : f32
    %67 = vector.broadcast %cst_16 : f32 to vector<64x16xf32>
    %68 = arith.mulf %66, %67 : vector<64x16xf32>
    %69 = tpu.iota {dimensions = array<i32: 1>} : vector<4x16x16xi32>
    %70 = tpu.iota {dimensions = array<i32: 2>} : vector<4x16x16xi32>
    %71 = arith.cmpi sle, %70, %69 : vector<4x16x16xi32>
    %72 = vector.shape_cast %71 : vector<4x16x16xi1> to vector<64x16xi1>
    %cst_17 = arith.constant 0xFF800000 : f32
    %73 = vector.broadcast %cst_17 : f32 to vector<64x16xf32>
    %74 = arith.select %72, %68, %73 : vector<64x16xi1>, vector<64x16xf32>
    %cst_18 = arith.constant dense<0xFF800000> : vector<64xf32>
    %75 = vector.multi_reduction <maximumf>, %74, %cst_18 [1] : vector<64x16xf32> to vector<64xf32>
    %76 = vector.shape_cast %75 : vector<64xf32> to vector<64x1xf32>
    %77 = vector.broadcast %76 : vector<64x1xf32> to vector<64x16xf32>
    %78 = arith.subf %74, %77 : vector<64x16xf32>
    %79 = math.exp %78 : vector<64x16xf32>
    %cst_19 = arith.constant dense<0.000000e+00> : vector<64xf32>
    %80 = vector.multi_reduction <add>, %79, %cst_19 [1] : vector<64x16xf32> to vector<64xf32>
    %81 = vector.shape_cast %80 : vector<64xf32> to vector<64x1xf32>
    %82 = tpu.reciprocal %81 {approx = true} : vector<64x1xf32> -> vector<64x1xf32>
    %83 = vector.broadcast %82 : vector<64x1xf32> to vector<64x16xf32>
    %84 = arith.mulf %79, %83 : vector<64x16xf32>
    %85 = vector.extract_strided_slice %84 {offsets = [0, 0], sizes = [16, 16], strides = [1, 1]} : vector<64x16xf32> to vector<16x16xf32>
    %86 = vector.extract_strided_slice %19 {offsets = [0, 0], sizes = [16, 16], strides = [1, 1]} : vector<16x64xf32> to vector<16x16xf32>
    %cst_20 = arith.constant dense<0.000000e+00> : vector<16x16xf32>
    %87 = tpu.matmul %85, %86, %cst_20 {dimension_numbers = #tpu.dot_dimension_numbers<[1], [0], [0], [1], [0, 0, 1, 1], [], []>} : vector<16x16xf32>, vector<16x16xf32>, vector<16x16xf32> -> vector<16x16xf32>
    %88 = vector.extract_strided_slice %84 {offsets = [16, 0], sizes = [16, 16], strides = [1, 1]} : vector<64x16xf32> to vector<16x16xf32>
    %89 = vector.extract_strided_slice %19 {offsets = [0, 16], sizes = [16, 16], strides = [1, 1]} : vector<16x64xf32> to vector<16x16xf32>
    %cst_21 = arith.constant dense<0.000000e+00> : vector<16x16xf32>
    %90 = tpu.matmul %88, %89, %cst_21 {dimension_numbers = #tpu.dot_dimension_numbers<[1], [0], [0], [1], [0, 0, 1, 1], [], []>} : vector<16x16xf32>, vector<16x16xf32>, vector<16x16xf32> -> vector<16x16xf32>
    %91 = vector.extract_strided_slice %84 {offsets = [32, 0], sizes = [16, 16], strides = [1, 1]} : vector<64x16xf32> to vector<16x16xf32>
    %92 = vector.extract_strided_slice %19 {offsets = [0, 32], sizes = [16, 16], strides = [1, 1]} : vector<16x64xf32> to vector<16x16xf32>
    %cst_22 = arith.constant dense<0.000000e+00> : vector<16x16xf32>
    %93 = tpu.matmul %91, %92, %cst_22 {dimension_numbers = #tpu.dot_dimension_numbers<[1], [0], [0], [1], [0, 0, 1, 1], [], []>} : vector<16x16xf32>, vector<16x16xf32>, vector<16x16xf32> -> vector<16x16xf32>
    %94 = vector.extract_strided_slice %84 {offsets = [48, 0], sizes = [16, 16], strides = [1, 1]} : vector<64x16xf32> to vector<16x16xf32>
    %95 = vector.extract_strided_slice %19 {offsets = [0, 48], sizes = [16, 16], strides = [1, 1]} : vector<16x64xf32> to vector<16x16xf32>
    %cst_23 = arith.constant dense<0.000000e+00> : vector<16x16xf32>
    %96 = tpu.matmul %94, %95, %cst_23 {dimension_numbers = #tpu.dot_dimension_numbers<[1], [0], [0], [1], [0, 0, 1, 1], [], []>} : vector<16x16xf32>, vector<16x16xf32>, vector<16x16xf32> -> vector<16x16xf32>
    %97 = tpu.concatenate %87, %90, %93, %96 in 1 : vector<16x16xf32>, vector<16x16xf32>, vector<16x16xf32>, vector<16x16xf32> -> vector<16x64xf32>
    %c0_24 = arith.constant 0 : index
    %c0_25 = arith.constant 0 : index
    %98 = vector.load %arg3[%c0_24, %c0_25] : memref<64x64xf32, #tpu.memory_space<vmem>>, vector<64x64xf32>
    %cst_26 = arith.constant dense<0.000000e+00> : vector<16x64xf32>
    %99 = tpu.matmul %97, %98, %cst_26 {dimension_numbers = #tpu.dot_dimension_numbers<[1], [0], [0], [1], [0, 0, 1, 1], [], []>} : vector<16x64xf32>, vector<64x64xf32>, vector<16x64xf32> -> vector<16x64xf32>
    %100 = arith.addf %1, %99 : vector<16x64xf32>
    %c0_27 = arith.constant 0 : index
    %c0_28 = arith.constant 0 : index
    %101 = vector.load %arg7[%c0_27, %c0_28] : memref<1x64xf32, #tpu.memory_space<vmem>>, vector<1x64xf32>
    %102 = arith.mulf %100, %100 : vector<16x64xf32>
    %cst_29 = arith.constant dense<0.000000e+00> : vector<16xf32>
    %103 = vector.multi_reduction <add>, %102, %cst_29 [1] : vector<16x64xf32> to vector<16xf32>
    %104 = vector.shape_cast %103 : vector<16xf32> to vector<16x1xf32>
    %cst_30 = arith.constant 6.400000e+01 : f32
    %105 = vector.broadcast %cst_30 : f32 to vector<16x1xf32>
    %106 = arith.divf %104, %105 : vector<16x1xf32>
    %cst_31 = arith.constant 9.99999974E-6 : f32
    %107 = vector.broadcast %cst_31 : f32 to vector<16x1xf32>
    %108 = arith.addf %106, %107 : vector<16x1xf32>
    %109 = math.rsqrt %108 : vector<16x1xf32>
    %110 = vector.broadcast %109 : vector<16x1xf32> to vector<16x64xf32>
    %111 = arith.mulf %100, %110 : vector<16x64xf32>
    %112 = vector.broadcast %101 : vector<1x64xf32> to vector<16x64xf32>
    %113 = arith.mulf %111, %112 : vector<16x64xf32>
    %c0_32 = arith.constant 0 : index
    %c0_33 = arith.constant 0 : index
    %114 = vector.load %arg4[%c0_32, %c0_33] : memref<64x384xf32, #tpu.memory_space<vmem>>, vector<64x384xf32>
    %cst_34 = arith.constant dense<0.000000e+00> : vector<16x384xf32>
    %115 = tpu.matmul %113, %114, %cst_34 {dimension_numbers = #tpu.dot_dimension_numbers<[1], [0], [0], [1], [0, 0, 1, 1], [], []>} : vector<16x64xf32>, vector<64x384xf32>, vector<16x384xf32> -> vector<16x384xf32>
    %116 = vector.extract_strided_slice %115 {offsets = [0, 0], sizes = [16, 192], strides = [1, 1]} : vector<16x384xf32> to vector<16x192xf32>
    %117 = vector.extract_strided_slice %115 {offsets = [0, 192], sizes = [16, 192], strides = [1, 1]} : vector<16x384xf32> to vector<16x192xf32>
    %118 = arith.negf %116 : vector<16x192xf32>
    %119 = math.exp %118 : vector<16x192xf32>
    %cst_35 = arith.constant 1.000000e+00 : f32
    %120 = vector.broadcast %cst_35 : f32 to vector<16x192xf32>
    %121 = arith.addf %120, %119 : vector<16x192xf32>
    %122 = arith.divf %120, %121 : vector<16x192xf32>
    %123 = arith.mulf %116, %122 : vector<16x192xf32>
    %124 = arith.mulf %123, %117 : vector<16x192xf32>
    %c0_36 = arith.constant 0 : index
    %c0_37 = arith.constant 0 : index
    %125 = vector.load %arg5[%c0_36, %c0_37] : memref<192x64xf32, #tpu.memory_space<vmem>>, vector<192x64xf32>
    %cst_38 = arith.constant dense<0.000000e+00> : vector<16x64xf32>
    %126 = tpu.matmul %124, %125, %cst_38 {dimension_numbers = #tpu.dot_dimension_numbers<[1], [0], [0], [1], [0, 0, 1, 1], [], []>} : vector<16x192xf32>, vector<192x64xf32>, vector<16x64xf32> -> vector<16x64xf32>
    %127 = arith.addf %100, %126 : vector<16x64xf32>
    %c0_39 = arith.constant 0 : index
    %c0_40 = arith.constant 0 : index
    %c0_41 = arith.constant 0 : index
    %128 = vector.load %arg9[%c0_39, %c0_40, %c0_41] : memref<1x16x64xf32, #tpu.memory_space<vmem>>, vector<1x16x64xf32>
    %129 = vector.shape_cast %128 : vector<1x16x64xf32> to vector<16x64xf32>
    %130 = vector.shape_cast %127 : vector<16x64xf32> to vector<1x16x64xf32>
    tpu.vector_store %arg9[%c0_39, %c0_40, %c0_41], %130 {strides = array<i32>} : memref<1x16x64xf32, #tpu.memory_space<vmem>>, vector<1x16x64xf32>,
    return
  }
  func.func @transform_0(%arg0: i32) -> (i32, i32, i32) {
    %c0_i32 = arith.constant 0 : i32
    %c0_i32_0 = arith.constant 0 : i32
    %c0_i32_1 = arith.constant 0 : i32
    return %arg0, %c0_i32, %c0_i32_0 : i32, i32, i32
  }
  func.func @transform_1(%arg0: i32) -> (i32, i32) {
    %c0_i32 = arith.constant 0 : i32
    %c0_i32_0 = arith.constant 0 : i32
    %c0_i32_1 = arith.constant 0 : i32
    return %c0_i32, %c0_i32_0 : i32, i32
  }
  func.func @transform_2(%arg0: i32) -> (i32, i32) {
    %c0_i32 = arith.constant 0 : i32
    %c0_i32_0 = arith.constant 0 : i32
    %c0_i32_1 = arith.constant 0 : i32
    return %c0_i32, %c0_i32_0 : i32, i32
  }
  func.func @transform_3(%arg0: i32) -> (i32, i32) {
    %c0_i32 = arith.constant 0 : i32
    %c0_i32_0 = arith.constant 0 : i32
    %c0_i32_1 = arith.constant 0 : i32
    return %c0_i32, %c0_i32_0 : i32, i32
  }
  func.func @transform_4(%arg0: i32) -> (i32, i32) {
    %c0_i32 = arith.constant 0 : i32
    %c0_i32_0 = arith.constant 0 : i32
    %c0_i32_1 = arith.constant 0 : i32
    return %c0_i32, %c0_i32_0 : i32, i32
  }
  func.func @transform_5(%arg0: i32) -> (i32, i32) {
    %c0_i32 = arith.constant 0 : i32
    %c0_i32_0 = arith.constant 0 : i32
    %c0_i32_1 = arith.constant 0 : i32
    return %c0_i32, %c0_i32_0 : i32, i32
  }
  func.func @transform_6(%arg0: i32) -> (i32, i32) {
    %c0_i32 = arith.constant 0 : i32
    %c0_i32_0 = arith.constant 0 : i32
    %c0_i32_1 = arith.constant 0 : i32
    return %c0_i32, %c0_i32_0 : i32, i32
  }
  func.func @transform_7(%arg0: i32) -> (i32, i32) {
    %c0_i32 = arith.constant 0 : i32
    %c0_i32_0 = arith.constant 0 : i32
    %c0_i32_1 = arith.constant 0 : i32
    return %c0_i32, %c0_i32_0 : i32, i32
  }
  func.func @transform_8(%arg0: i32) -> (i32, i32, i32) {
    %c0_i32 = arith.constant 0 : i32
    %c0_i32_0 = arith.constant 0 : i32
    %c0_i32_1 = arith.constant 0 : i32
    return %arg0, %c0_i32, %c0_i32_0 : i32, i32, i32
  }
}

</mosaic_0001>

<bundles_post_ra>
// kernel: tpu_custom_call.1
= control target key start
LH: loop header
LB: loop body
LE: loop exit
PB: predicated region body
PF: predicated region fallthrough
CT: control target
= control target key end

     0   :  { %13 = vsyncpa [#allocation3], 0  ;;  %s3379_s0 = inlined_call_operand.hbm [shape: f32[2,16,64], index: 0, kind: input, shape index: {}]   ;;  %s3380_s1 = inlined_call_operand.vmem [shape: f32[64,192], index: 1, kind: input, shape index: {}]   ;;  %s3381_s2 = inlined_call_operand.hbm [shape: f32[64,64], index: 2, kind: input, shape index: {}]   ;;  %s3382_s3 = inlined_call_operand.vmem [shape: f32[64,384], index: 3, kind: input, shape index: {}]   ;;  %s3383_s4 = inlined_call_operand.vmem [shape: f32[192,64], index: 4, kind: input, shape index: {}]   ;;  %s3384_s5 = inlined_call_operand.vmem [shape: f32[1,64], index: 5, kind: input, shape index: {}]   ;;  %s3385_s6 = inlined_call_operand.vmem [shape: f32[1,64], index: 6, kind: input, shape index: {}]   ;;  %s3386_s7 = inlined_call_operand.vmem [shape: f32[16,64], index: 7, kind: input, shape index: {}]   ;;  %s3387_s8 = inlined_call_operand.hbm [shape: f32[2,16,64], index: 8, kind: output, shape index: {}]  }
   0x1   :  { %15 = vsyncpa [#allocation3 + $0x1], 0 }
   0x2   :  { %16 = vsyncpa [#allocation6], 0 }
   0x3   :  { %17 = vsyncpa [#allocation4], 0 }
   0x4   :  { %19 = vsyncpa [#allocation4 + $0x1], 0  ;;  %s2762_s27 = smov 0   ;;  %s2764_s28 = smov 0  }
   0x5   :  { %s2766_s29 = smov 0   ;;  %s2768_s30 = smov 0  }
   0x6 LB: > { %s2783_s9 = sadd.s32 4294967295, %s2694_s30   ;;  %s2036_s10 = sadd.s32 4294967294, %s2694_s30   ;;  %s2694_s30 = sphi %s2768_s30, %s3411_s30   ;;  %s2690_s29 = sphi %s2766_s29, %s3414_s29   ;;  %s2686_s28 = sphi %s2764_s28, %s3413_s28   ;;  %s2682_s27 = sphi %s2762_s27, %s3412_s27  }
   0x7   : > { %p45_p0 = scmp.ne.s32.totalorder %s2686_s28, %s2682_s27  ;;  %p3388_p1 = scmp.eq.s32.totalorder %s2783_s9, 0 }
   0x8   : > { %p222_p3 = scmp.eq.s32.totalorder %s2036_s10, 1  ;;  %p2037_p5 = scmp.ge.s32.totalorder %s2694_s30, 1 }
   0x9   : > { %p2792_p4 = por %p3388_p1, %p45_p0  ;;  %p229_p7 = scmp.lt.s32.totalorder %s2694_s30, 3 }
   0xa   : > { %p2797_p6 = por %p222_p3, %p45_p0  ;;  %s2696_s14 = smov [#allocation5]  }
   0xb   : > { %s3394_s11 = scalar_select %p2792_p4, 1, 0 }
   0xc   : > { %s3395_s12 = scalar_select %p2797_p6, 1, 0 }
   0xd   : > { %p2802_p8 = pnand %p2037_p5, %p229_p7  ;;  %s244_s15 = sshll.u32 %s2696_s14, 4  ;;  %s2806_s15 = int_to_ptr.vmem [resolvable:$true] %s244_s15 }
   0xe   : > { %s2818_s17 = sadd.s32 1, %s2694_s30   ;;  %s32_s18 = sadd.s32 1, %s2690_s29 }
   0xf   : > { %s3396_s13 = scalar_select %p2802_p8, 1, 0 }
  0x10   : > { %p2388_p9 = pneg %p2802_p8  ;;  %3398 = sst [smem:[#allocation11_spill]] %s2818_s17 }
  0x11   : > { %s29_s19 = ssub.s32 %s2694_s30, %s2818_s17  ;;  %s2566_s22 = scalar_lea.hbm %s3381_s2, 1024 }
  0x12   : > { %p2813_p11 = pnand %p2388_p9, %p3388_p1  ;;  %p2567_p12 = scmp.ne.s32.totalorder %s3381_s2, %s2566_s22 }
  0x13   : > { %p2573_p5 = scmp.lt.u32.totalorder %s2566_s22, %s3381_s2 }
  0x14   : > { %p2568_p13 = pneg %p2813_p11 }
  0x16   : > { %p2569_p0 = pnand %p2568_p13, %p2567_p12 }
  0x18   : > { %p2570_p3 = pneg %p2569_p0 }
  0x1a   : > { %p2575_p7 = pnand %p2573_p5, %p2570_p3 }
  0x1c   : > { %2578 = shalt.err (!%p2575_p7)
}
  0x1d   : > { %s2579_s10 = scalar_lea.vmem %s2806_s15, 1024  ;;  %p2587_p2 = scmp.lt.s32.totalorder %s2806_s15, %s2806_s15 }
  0x1e   : > { %p2580_p9 = scmp.ne.s32.totalorder %s2806_s15, %s2579_s10  ;;  %p2588_p6 = scmp.lt.s32.totalorder %s2579_s10, %s2579_s10 }
  0x20   : > { %p2582_p10 = pnand %p2580_p9, %p2568_p13  ;;  %p2589_p4 = por %p2588_p6, %p2587_p2 }
  0x22   : > { %p2583_p1 = pneg %p2582_p10 }
  0x24   : > { %p2590_p8 = pnand %p2589_p4, %p2583_p1 }
  0x26   : > { %2593 = shalt.err (!%p2590_p8)
}
  0x27   : > { %s3393_s14 = smov 128   ;;  %s2698_s20 = smov 8  }
  0x28   : > { %2391 = dma.hbm_to_vmem [thread:$0]  (!%p2813_p11), %s3381_s2, 1024, %s2806_s15, [#allocation6], %s3393_s14, %s3393_s14, %s2698_s20  }
  0x29   : > { %p30_p1 = scmp.eq.s32.totalorder %s29_s19, 0  ;;  %p39_p2 = scmp.ne.s32.totalorder %s2690_s29, %s2686_s28 }
  0x2a   : > { %p40_p4 = scmp.eq.s32.totalorder %s2694_s30, 0  ;;  %p2401_p6 = scmp.lt.s32.totalorder %s2694_s30, 2 }
  0x2b   : > { %s2852_s23 = scalar_select %p30_p1, %s2690_s29, %s32_s18  }
  0x2c   : > { %p41_p8 = por %p40_p4, %p39_p2  ;;  %p3399_p10 = scmp.eq.s32.totalorder %s2783_s9, 1 }
  0x2d   : > { %s273_s16 = sand.u32 1, %s2690_s29   ;;  %s2092_s25 = sshll.u32 %s2694_s30, 8 }
  0x2e   : > { %p2856_p12 = por %p3399_p10, %p39_p2  ;;  %s2040_s26 = sshll.u32 %s273_s16, 4 }
  0x2f   : > { %s2865_s21 = scalar_lea.hbm %s3379_s0, %s2092_s25  ;;  %s277_s15 = scalar_lea.vmem [#allocation2], %s2040_s26 }
  0x30   : > { %s284_s18 = sshll.u32 %s277_s15, 4  ;;  %p2867_p11 = pnand %p2401_p6, %p41_p8  ;;  %s2871_s18 = int_to_ptr.vmem [resolvable:$true] %s284_s18 }
  0x31   : > { %s2873_s22 = scalar_lea.sflag [#allocation3], %s273_s16  ;;  %s2594_s14 = scalar_lea.hbm %s2865_s21, 256 }
  0x32   : > { %p2595_p13 = scmp.ne.s32.totalorder %s2865_s21, %s2594_s14  ;;  %p2596_p0 = pneg %p2867_p11 }
  0x33   : > { %s2599_s26 = scalar_lea.hbm %s3379_s0, 512  ;;  %p2600_p7 = scmp.lt.u32.totalorder %s2865_s21, %s3379_s0 }
  0x34   : > { %p2597_p3 = pnand %p2596_p0, %p2595_p13  ;;  %p2601_p9 = scmp.lt.u32.totalorder %s2599_s26, %s2594_s14 }
  0x35   : > { %p2603_p2 = scmp.lt.u32.totalorder %s2594_s14, %s2865_s21 }
  0x36   : > { %p2598_p5 = pneg %p2597_p3  ;;  %p2602_p1 = por %p2601_p9, %p2600_p7 }
  0x38   : > { %p2604_p4 = por %p2603_p2, %p2602_p1 }
  0x3a   : > { %p2605_p6 = pnand %p2604_p4, %p2598_p5 }
  0x3c   : > { %2608 = shalt.err (!%p2605_p6)
}
  0x3d   : > { %s2609_s16 = scalar_lea.vmem %s2871_s18, 256  ;;  %s2699_s17 = smov [#allocation2]  }
  0x3e   : > { %p2610_p8 = scmp.ne.s32.totalorder %s2871_s18, %s2609_s16  ;;  %s2614_s25 = sshll.u32 %s2699_s17, 4  ;;  %s2615_s25 = int_to_ptr.vmem [resolvable:$false] %s2614_s25 }
  0x3f   : > { %s2616_s10 = scalar_lea.vmem %s2615_s25, 512  ;;  %p2617_p3 = scmp.lt.s32.totalorder %s2871_s18, %s2615_s25 }
  0x40   : > { %p2612_p10 = pnand %p2610_p8, %p2596_p0  ;;  %p2618_p7 = scmp.lt.s32.totalorder %s2616_s10, %s2609_s16 }
  0x42   : > { %p2613_p13 = pneg %p2612_p10  ;;  %p2619_p9 = por %p2618_p7, %p2617_p3 }
  0x44   : > { %p2620_p1 = pnand %p2619_p9, %p2613_p13 }
  0x46   : > { %2623 = shalt.err (!%p2620_p1)
}
  0x47   : > { %s3402_s14 = smov 128   ;;  %p3403_p0 = scmp.ne.s32.totalorder %s3396_s13, 0 }
  0x48   : > { %2395 = dma.hbm_to_vmem [thread:$0]  (!%p2867_p11), %s2865_s21, 256, %s2871_s18, %s2873_s22, %s3402_s14, %s3402_s14, %s2698_s20  }
  0x49   : > { %296 = sbr.rel (%p3403_p0) target bundleno = 2577 (0xa11), region = 52  ;;  %s2907_s26 = sand.u32 (!%p3403_p0), 1, %s2686_s28  }
  0x4a   : > { %s2044_s15 = sshll.u32 (!%p3403_p0), %s2907_s26, 4  ;;  %s299_s16 = scalar_lea.sflag (!%p3403_p0), [#allocation3], %s2907_s26 }
  0x4b   : > { %s302_s19 = scalar_lea.vmem (!%p3403_p0), [#allocation2], %s2044_s15  ;;  %p3404_p5 = scmp.ne.s32.totalorder (!%p3403_p0), %s3394_s11, 0 }
  0x50   : > { %2669 = dma.done.wait (%p3404_p5), %s299_s16, 256  }
  0x51   : > { %2671 = vsyncadd (%p3404_p5), %s299_s16, 4294967040  ;;  %p3405_p11 = scmp.eq.s32.totalorder %s2783_s9, 0 }
  0x53   : > { %2673 = dma.done.wait (%p3405_p11), [#allocation6], 1024   ;;  %p3406_p2 = pmov %p3405_p11 }
  0x54   : > { %v2921_v0 = vld [vmem:[%s302_s19] sm:$0xff]  ;;  %vm344_vm0 = vcmask 523264   ;;  %v2923_v1 = vld [vmem:[%s302_s19 + $0x8] sm:$0xff]  ;;  %v2700_v25 = vmov 0.0   ;;  %s2701_s16 = smov 96   ;;  %s2702_s19 = smov 64  }
  0x55   : > { %2675 = vsyncadd (%p3406_p2), [#allocation6], 4294966272  ;;  %v342_v2 = vmul.f32 %v2921_v0, %v2921_v0  ;;  %v343_v3 = vmul.f32 %v2923_v1, %v2923_v1  ;;  %v369_v6 = vld [vmem:[%s3380_s1 + $0x8] sm:$0xff]  ;;  %v371_v7 = vld [vmem:[%s3380_s1 + $0x18] sm:$0xff]  ;;  %454 = vmatprep.mubr.f32.mxu0 %v2700_v25  ;;  %s2703_s20 = smov 32   ;;  %s2704_s22 = smov 120  }
  0x56   : > { %v2240_v8 = vpack.c.bf16 %v371_v7, %v369_v6  ;;  %v368_v9 = vld [vmem:[%s3380_s1] sm:$0xff]  ;;  %v370_v10 = vld [vmem:[%s3380_s1 + $0x10] sm:$0xff]  ;;  %v373_v12 = vld [vmem:[%s3380_s1 + $0x28] sm:$0xff]  ;;  %s2705_s17 = smov 8   ;;  %s2706_s25 = smov 72   ;;  %vm545_vm1 = vcmask 64512  }
  0x57   : > { %v345_v4 = vsel %vm344_vm0, %v342_v2, 0.0  ;;  %v348_v5 = vsel %vm344_vm0, %v343_v3, 0.0  ;;  %v2242_v11 = vpack.c.bf16 %v370_v10, %v368_v9  ;;  %v375_v13 = vld [vmem:[%s3380_s1 + $0x38] sm:$0xff]  ;;  %v372_v15 = vld [vmem:[%s3380_s1 + $0x20] sm:$0xff]  ;;  %v374_v16 = vld [vmem:[%s3380_s1 + $0x30] sm:$0xff]  ;;  %s2707_s10 = smov 112  }
  0x58   : > { %346 = vadd.xlane.f32.xlu0 %v345_v4  ;;  %2241 = vmatprep.subr.bf16.mxu0 %v2240_v8  ;;  %v2244_v14 = vpack.c.bf16 %v375_v13, %v373_v12  ;;  %v2246_v17 = vpack.c.bf16 %v374_v16, %v372_v15  ;;  %v377_v18 = vld [vmem:[%s3380_s1 + $0x48] sm:$0xff]  ;;  %v379_v19 = vld [vmem:[%s3380_s1 + $0x58] sm:$0xff]  ;;  %v376_v20 = vld [vmem:[%s3380_s1 + $0x40] sm:$0xff]  ;;  %s2708_s14 = smov 56   ;;  %s2709_s11 = smov 48   ;;  %vm566_vm2 = vcmask 130048  }
  0x59   : > { %2243 = vmatpush1.bf16.msra.mxu0 %v2242_v11  ;;  %v2248_v21 = vpack.c.bf16 %v379_v19, %v377_v18  ;;  %v378_v22 = vld [vmem:[%s3380_s1 + $0x50] sm:$0xff]  ;;  %v381_v23 = vld [vmem:[%s3380_s1 + $0x68] sm:$0xff]  ;;  %v383_v24 = vld [vmem:[%s3380_s1 + $0x78] sm:$0xff]  ;;  %s2710_s13 = smov 40   ;;  %s2711_s21 = smov 104   ;;  %vm1476_vm6 = vcmask 261120  }
  0x5a   : > { %2245 = vmatprep.subr.bf16.mxu0 %v2244_v14  ;;  %v2250_v26 = vpack.c.bf16 %v378_v22, %v376_v20  ;;  %v2252_v27 = vpack.c.bf16 %v383_v24, %v381_v23  ;;  %v380_v28 = vld [vmem:[%s3380_s1 + $0x60] sm:$0xff]  ;;  %v382_v29 = vld [vmem:[%s3380_s1 + $0x70] sm:$0xff]  ;;  %v468_v32 = vld [vmem:[%s3386_s7 + $0x8] sm:$0xff]  ;;  %s2712_s18 = smov 80   ;;  %vm1479_vm7 = vcmask 392192  }
  0x5b   : > { %v2254_v30 = vpack.c.bf16 %v382_v29, %v380_v28  ;;  %v467_v31 = vld [vmem:[%s3386_s7] sm:$0xff]  ;;  %vm3042_vm3 = vmpackc.low %vm566_vm2, %vm566_vm2 }
  0x5c   : > { %349 = vadd.xlane.f32.xlu0 %v348_v5  ;;  %483 = vrot.lane.b32.xlu1 %v467_v31, %s2701_s16  ;;  %v2047_v40 = vld [vmem:[%s3384_s5] ss:$0 sm:$0xff] }
  0x5d   : > { %2247 = vmatpush1.bf16.msra.mxu0 %v2246_v17 }
  0x5e   : > { %2249 = vmatprep.subr.bf16.mxu0 %v2248_v21 }
  0x60   : > { %485 = vrot.lane.b32.xlu1 %v468_v32, %s2701_s16 }
  0x61   : > { %2251 = vmatpush1.bf16.msra.mxu0 %v2250_v26 }
  0x62   : > { %2253 = vmatprep.subr.bf16.mxu0 %v2252_v27 }
  0x64   : > { %511 = vrot.lane.b32.xlu1 %v468_v32, %s2702_s19 }
  0x65   : > { %2255 = vmatpush1.bf16.msra.mxu0 %v2254_v30 }
  0x68   : > { %491 = vrot.lane.b32.xlu1 %v467_v31, %s2703_s20 }
  0x6c   : > { %493 = vrot.lane.b32.xlu1 %v468_v32, %s2703_s20 }
  0x72   : > { %509 = vrot.lane.b32.xlu0 %v467_v31, %s2702_s19 }
  0xce   : > { %v484_v46 = vpop.permute.xlu1 %483 }
  0xd2   : > { %v486_v47 = vpop.permute.xlu1 %485 }
  0xd6   : > { %v512_v48 = vpop.permute.xlu1 %511 }
  0xda   : > { %v492_v50 = vpop.permute.xlu1 %491 }
  0xde   : > { %v494_v58 = vpop.permute.xlu1 %493 }
  0xe5   : > { %v347_v33 = vpop.xlane.xlu0 %346 }
  0xe6   : > { %v352_v34 = vmul.f32 0.015625, %v347_v33 }
  0xe8   : > { %v354_v35 = vadd.f32 1e-05, %v352_v34 }
  0xe9   : > { %v350_v36 = vpop.xlane.xlu0 %349 }
  0xea   : > { %2510 = vrsqrt.f32 %v354_v35  ;;  %v353_v37 = vmul.f32 0.015625, %v350_v36 }
  0xec   : > { %v355_v38 = vadd.f32 1e-05, %v353_v37 }
  0xed   : > { %v510_v49 = vpop.permute.xlu0 %509 }
  0xee   : > { %2512 = vrsqrt.f32 %v355_v38 }
  0xf4   : > { %v2511_v39 = vpop.eup %2510 }
  0xf5   : > { %v358_v41 = vmul.f32 %v2511_v39, %v2921_v0 }
  0xf7   : > { %v366_v42 = vmul.f32 %v2047_v40, %v358_v41 }
  0xf8   : > { %v2513_v43 = vpop.eup %2512 }
  0xf9   : > { %2048 = vmatmul.mubr.msk.f32.vlgmr.msra.gmra.mrb[0].mxu0 %vm344_vm0, %v366_v42  ;;  %v359_v44 = vmul.f32 %v2513_v43, %v2923_v1 }
  0xfa   : > { %460 = vmatprep.mubr.f32.mxu0 %v2700_v25 }
  0xfb   : > { %v367_v45 = vmul.f32 %v2047_v40, %v359_v44 }
  0xfd   : > { %2049 = vmatmul.mubr.msk.f32.gmra.mrb[2].mxu0 %vm344_vm0, %v367_v45 }
 0x1cc   : > { %v456_v51 = vpop.f32.mrb[0].mxu0 }
 0x1cd   : > { %v515_v52 = vmul.f32 %v510_v49, %v456_v51  ;;  %v458_v53 = vpop.f32.mrb[1].mxu0  ;;  %v489_v62 = vmul.f32 %v484_v46, %v456_v51  ;;  %v497_v2 = vmul.f32 %v492_v50, %v456_v51  ;;  %v469_v3 = vmul.f32 %v467_v31, %v456_v51 }
 0x1cf   : > { %519 = vrot.lane.b32.xlu1 %v515_v52, %s2701_s16 }
 0x1d0   : > { %v462_v54 = vpop.f32.mrb[2].mxu0 }
 0x1d1   : > { %v464_v55 = vpop.f32.mrb[3].mxu0  ;;  %v490_v56 = vmul.f32 %v486_v47, %v462_v54  ;;  %v516_v57 = vmul.f32 %v512_v48, %v462_v54  ;;  %v498_v61 = vmul.f32 %v494_v58, %v462_v54  ;;  %v470_v63 = vmul.f32 %v468_v32, %v462_v54 }
 0x1d2   : > { %v3001_v59 = vpack.c.bf16 %v464_v55, %v458_v53  ;;  %v3003_v60 = vpack.i.bf16 %v464_v55, %v458_v53 }
 0x1d3   : > { %531 = vrot.lane.b32.xlu0 %v490_v56, %s2701_s16  ;;  %521 = vrot.lane.b32.xlu1 %v516_v57, %s2701_s16 }
 0x1d7   : > { %503 = vrot.lane.b32.xlu0 %v498_v61, %s2701_s16  ;;  %529 = vrot.lane.b32.xlu1 %v489_v62, %s2701_s16 }
 0x1db   : > { %475 = vrot.lane.b32.xlu0 %v470_v63, %s2701_s16  ;;  %501 = vrot.lane.b32.xlu1 %v497_v2, %s2701_s16 }
 0x1df   : > { %473 = vrot.lane.b32.xlu1 %v469_v3, %s2701_s16 }
 0x241   : > { %v520_v4 = vpop.permute.xlu1 %519 }
 0x242   : > { %v525_v16 = vsub.f32 %v515_v52, %v520_v4 }
 0x245   : > { %v522_v5 = vpop.permute.xlu1 %521  ;;  %v532_v7 = vpop.permute.xlu0 %531 }
 0x246   : > { %v536_v11 = vadd.f32 %v532_v7, %v498_v61  ;;  %v526_v13 = vsub.f32 %v516_v57, %v522_v5 }
 0x248   : > { %v2455_v17 = vpack.i.bf16 %v526_v13, %v525_v16 }
 0x249   : > { %v530_v6 = vpop.permute.xlu1 %529  ;;  %v504_v18 = vpop.permute.xlu0 %503 }
 0x24a   : > { %v535_v9 = vadd.f32 %v530_v6, %v497_v2  ;;  %v3021_v19 = vadd.f32 %v504_v18, %v490_v56 }
 0x24c   : > { %v2460_v15 = vpack.i.bf16 %v536_v11, %v535_v9 }
 0x24d   : > { %v502_v8 = vpop.permute.xlu1 %501  ;;  %v476_v20 = vpop.permute.xlu0 %475 }
 0x24e   : > { %v3012_v10 = vadd.f32 %v502_v8, %v489_v62  ;;  %v480_v21 = vsub.f32 %v470_v63, %v476_v20  ;;  %v1003_v20 = vlaneseq }
 0x250   : > { %771 = vrot.lane.b32.xlu0 %v3012_v10, %s2704_s22  ;;  %539 = vrot.lane.b32.xlu1 %v3012_v10, %s2705_s17 }
 0x251   : > { %v474_v12 = vpop.permute.xlu1 %473 }
 0x252   : > { %v479_v14 = vsub.f32 %v469_v3, %v474_v12 }
 0x254   : > { %656 = vrot.lane.b32.xlu1 %v479_v14, %s2704_s22  ;;  %2461 = vrot.lane.b32.xlu0 %v2460_v15, %s2706_s25 }
 0x258   : > { %2456 = vrot.lane.b32.xlu1 %v2455_v17, %s2702_s19  ;;  %2471 = vrot.lane.b32.xlu0 %v2460_v15, %s2702_s19 }
 0x25c   : > { %765 = vrot.lane.b32.xlu1 %v479_v14, %s2707_s10  ;;  %541 = vrot.lane.b32.xlu0 %v3021_v19, %s2705_s17 }
 0x260   : > { %2466 = vrot.lane.b32.xlu1 %v2455_v17, %s2708_s14  ;;  %2481 = vrot.lane.b32.xlu0 %v2460_v15, %s2708_s14 }
 0x264   : > { %2476 = vrot.lane.b32.xlu1 %v2455_v17, %s2709_s11  ;;  %886 = vrot.lane.b32.xlu0 %v3012_v10, %s2707_s10 }
 0x268   : > { %2486 = vrot.lane.b32.xlu1 %v2455_v17, %s2710_s13  ;;  %2491 = vrot.lane.b32.xlu0 %v2460_v15, %s2709_s11 }
 0x26c   : > { %880 = vrot.lane.b32.xlu1 %v479_v14, %s2711_s21  ;;  %658 = vrot.lane.b32.xlu0 %v480_v21, %s2704_s22 }
 0x270   : > { %767 = vrot.lane.b32.xlu1 %v480_v21, %s2707_s10  ;;  %773 = vrot.lane.b32.xlu0 %v3021_v19, %s2704_s22 }
 0x274   : > { %882 = vrot.lane.b32.xlu1 %v480_v21, %s2711_s21  ;;  %888 = vrot.lane.b32.xlu0 %v3021_v19, %s2707_s10 }
 0x2c2   : > { %v540_v22 = vpop.permute.xlu1 %539  ;;  %v772_v23 = vpop.permute.xlu0 %771 }
 0x2c3   : > { %v546_v24 = vsel %vm545_vm1, %v479_v14, %v540_v22 }
 0x2c4   : > { %2150 = vmatprep.mubr.msk.f32.mxu1 %vm566_vm2, %v546_v24 }
 0x2c6   : > { %v657_v26 = vpop.permute.xlu1 %656  ;;  %v2462_v27 = vpop.permute.xlu0 %2461 }
 0x2c7   : > { %v2464_v30 = vunpack.i.h.bf16 %v2462_v27  ;;  %v2463_v31 = vunpack.i.l.bf16 %v2462_v27  ;;  %v662_v57 = vsel %vm545_vm1, %v657_v26, %v3012_v10 }
 0x2ca   : > { %v2457_v28 = vpop.permute.xlu1 %2456  ;;  %v2472_v29 = vpop.permute.xlu0 %2471 }
 0x2cb   : > { %v2459_v32 = vunpack.i.h.bf16 %v2457_v28  ;;  %v2458_v33 = vunpack.i.l.bf16 %v2457_v28  ;;  %v2474_v43 = vunpack.i.h.bf16 %v2472_v29  ;;  %v2473_v44 = vunpack.i.l.bf16 %v2472_v29 }
 0x2cd   : > { %v564_v34 = vsel %vm545_vm1, %v2458_v33, %v2463_v31  ;;  %v565_v35 = vsel %vm545_vm1, %v2459_v32, %v2464_v30 }
 0x2ce   : > { %v766_v37 = vpop.permute.xlu1 %765  ;;  %v542_v38 = vpop.permute.xlu0 %541  ;;  %v2256_v39 = vpack.c.bf16 %v565_v35, %v564_v34 }
 0x2cf   : > { %v777_v40 = vsel %vm545_vm1, %v766_v37, %v772_v23  ;;  %v547_v49 = vsel %vm545_vm1, %v480_v21, %v542_v38  ;;  %v1004_v21 = vshrl.u32 %v1003_v20, 7  ;;  %v1007_v23 = vand.u32 127, %v1003_v20 }
 0x2d0   : > { %2258 = vmatprep.subr.msk.bf16.mxu1 %vm3042_vm3, %v2256_v39  ;;  %2164 = vmatprep.mubr.msk.f32.mxu0 %vm566_vm2, %v777_v40 }
 0x2d1   : > { %2261 = vmatpush3.bf16.xpose.msk.msra.mxu1 %vm3042_vm3, %v2256_v39  ;;  %v1005_v22 = vadd.s32 8, %v1004_v21  ;;  %vm1008_vm5 = vcmp.le.s32.totalorder %v1007_v23, %v1004_v21 }
 0x2d2   : > { %v2467_v41 = vpop.permute.xlu1 %2466  ;;  %v2482_v42 = vpop.permute.xlu0 %2481 }
 0x2d3   : > { %v2469_v45 = vunpack.i.h.bf16 %v2467_v41  ;;  %v2468_v46 = vunpack.i.l.bf16 %v2467_v41  ;;  %v2484_v53 = vunpack.i.h.bf16 %v2482_v42  ;;  %v2483_v54 = vunpack.i.l.bf16 %v2482_v42 }
 0x2d4   : > { %vm1009_vm4 = vcmp.le.s32.totalorder %v1007_v23, %v1005_v22 }
 0x2d5   : > { %v676_v47 = vsel %vm545_vm1, %v2468_v46, %v2473_v44  ;;  %v677_v48 = vsel %vm545_vm1, %v2469_v45, %v2474_v43 }
 0x2d6   : > { %v2262_v50 = vpack.c.bf16 %v677_v48, %v676_v47  ;;  %v2477_v51 = vpop.permute.xlu1 %2476  ;;  %v887_v52 = vpop.permute.xlu0 %886 }
 0x2d7   : > { %v2479_v55 = vunpack.i.h.bf16 %v2477_v51  ;;  %v2478_v56 = vunpack.i.l.bf16 %v2477_v51 }
 0x2d8   : > { %2151 = vmatmul.mubr.msk.f32.vlgmr.msra.gmra.mrb[0].mxu1 %vm566_vm2, %v547_v49  ;;  %2264 = vmatprep.subr.msk.bf16.mxu1 %vm3042_vm3, %v2262_v50 }
 0x2d9   : > { %v791_v58 = vsel %vm545_vm1, %v2478_v56, %v2483_v54  ;;  %v792_v61 = vsel %vm545_vm1, %v2479_v55, %v2484_v53  ;;  %2267 = vmatpush3.bf16.xpose.msk.msra.mxu1 %vm3042_vm3, %v2262_v50  ;;  %2157 = vmatprep.mubr.msk.f32.mxu1 %vm566_vm2, %v662_v57 }
 0x2da   : > { %v2268_v62 = vpack.c.bf16 %v792_v61, %v791_v58  ;;  %v2487_v63 = vpop.permute.xlu1 %2486  ;;  %v2492_v2 = vpop.permute.xlu0 %2491 }
 0x2db   : > { %v2489_v3 = vunpack.i.h.bf16 %v2487_v63  ;;  %v2488_v4 = vunpack.i.l.bf16 %v2487_v63  ;;  %v2494_v5 = vunpack.i.h.bf16 %v2492_v2  ;;  %v2493_v6 = vunpack.i.l.bf16 %v2492_v2 }
 0x2dc   : > { %2270 = vmatprep.subr.msk.bf16.mxu0 %vm3042_vm3, %v2268_v62 }
 0x2dd   : > { %v907_v7 = vsel %vm545_vm1, %v2489_v3, %v2494_v5  ;;  %v906_v8 = vsel %vm545_vm1, %v2488_v4, %v2493_v6  ;;  %2273 = vmatpush3.bf16.xpose.msk.msra.mxu0 %vm3042_vm3, %v2268_v62 }
 0x2de   : > { %v2274_v9 = vpack.c.bf16 %v907_v7, %v906_v8  ;;  %v881_v10 = vpop.permute.xlu1 %880  ;;  %v659_v11 = vpop.permute.xlu0 %658  ;;  %2281 = vmatprep.subr.bf16.mxu0 %v3001_v59 }
 0x2df   : > { %v892_v12 = vsel %vm545_vm1, %v881_v10, %v887_v52  ;;  %v663_v13 = vsel %vm545_vm1, %v659_v11, %v3021_v19 }
 0x2e0   : > { %2158 = vmatmul.mubr.msk.f32.vlgmr.msra.gmra.mrb[2].mxu1 %vm566_vm2, %v663_v13  ;;  %2276 = vmatprep.subr.msk.bf16.mxu1 %vm3042_vm3, %v2274_v9 }
 0x2e1   : > { %2279 = vmatpush3.bf16.xpose.msk.msra.mxu1 %vm3042_vm3, %v2274_v9  ;;  %2171 = vmatprep.mubr.msk.f32.mxu1 %vm566_vm2, %v892_v12 }
 0x2e2   : > { %v768_v14 = vpop.permute.xlu1 %767  ;;  %v774_v15 = vpop.permute.xlu0 %773 }
 0x2e3   : > { %v778_v16 = vsel %vm545_vm1, %v768_v14, %v774_v15 }
 0x2e4   : > { %2165 = vmatmul.mubr.msk.f32.vlgmr.msra.gmra.mrb[4].mxu0 %vm566_vm2, %v778_v16 }
 0x2e5   : > { %2283 = vmatpush3.bf16.msra.mxu0 %v3001_v59 }
 0x2e6   : > { %v883_v17 = vpop.permute.xlu1 %882  ;;  %v889_v18 = vpop.permute.xlu0 %888 }
 0x2e7   : > { %v893_v19 = vsel %vm545_vm1, %v883_v17, %v889_v18 }
 0x2e8   : > { %2172 = vmatmul.mubr.msk.f32.vlgmr.msra.gmra.mrb[4].mxu1 %vm566_vm2, %v893_v19 }
 0x3ab   : > { %v2152_v24 = vpop.f32.mrb[0].mxu1 }
 0x3ac   : > { %v996_v26 = vmul.f32 0.25, %v2152_v24  ;;  %v645_v27 = vpop.f32.mrb[1].mxu1 }
 0x3ad   : > { %v995_v32 = vmul.f32 0.25, %v645_v27 }
 0x3ae   : > { %v1011_v28 = vsel %vm1009_vm4, %v996_v26, -inf }
 0x3af   : > { %v1021_v29 = vsel %vm566_vm2, %v1011_v28, -inf  ;;  %v1010_v44 = vsel %vm1008_vm5, %v995_v32, -inf }
 0x3b0   : > { %1022 = vmax.xlane.f32.xlu0 %v1021_v29  ;;  %v1018_v47 = vsel %vm566_vm2, %v1010_v44, -inf }
 0x3b3   : > { %v2159_v59 = vpop.f32.mrb[2].mxu1 }
 0x3b4   : > { %v756_v30 = vpop.f32.mrb[3].mxu1  ;;  %v998_v41 = vmul.f32 0.25, %v2159_v59 }
 0x3b5   : > { %v997_v35 = vmul.f32 0.25, %v756_v30 }
 0x3b6   : > { %v1013_v50 = vsel %vm1009_vm4, %v998_v41, -inf }
 0x3b7   : > { %v2166_v31 = vpop.f32.mrb[4].mxu0  ;;  %v1012_v46 = vsel %vm1008_vm5, %v997_v35, -inf  ;;  %v1027_v52 = vsel %vm566_vm2, %v1013_v50, -inf }
 0x3b8   : > { %v1000_v33 = vmul.f32 0.25, %v2166_v31  ;;  %v871_v34 = vpop.f32.mrb[5].mxu0  ;;  %v1024_v49 = vsel %vm566_vm2, %v1012_v46, -inf }
 0x3b9   : > { %v999_v36 = vmul.f32 0.25, %v871_v34 }
 0x3ba   : > { %v1015_v37 = vsel %vm1009_vm4, %v1000_v33, -inf }
 0x3bb   : > { %v2173_v38 = vpop.f32.mrb[4].mxu1  ;;  %v1033_v39 = vsel %vm566_vm2, %v1015_v37, -inf  ;;  %v1014_v40 = vsel %vm1008_vm5, %v999_v36, -inf }
 0x3bc   : > { %1034 = vmax.xlane.f32.xlu1 %v1033_v39  ;;  %v986_v42 = vpop.f32.mrb[5].mxu1  ;;  %v1030_v43 = vsel %vm566_vm2, %v1014_v40, -inf  ;;  %v1002_v48 = vmul.f32 0.25, %v2173_v38 }
 0x3bd   : > { %v1001_v45 = vmul.f32 0.25, %v986_v42  ;;  %1031 = vmax.xlane.f32.xlu0 %v1030_v43 }
 0x3be   : > { %v1017_v54 = vsel %vm1009_vm4, %v1002_v48, -inf }
 0x3bf   : > { %v1016_v51 = vsel %vm1008_vm5, %v1001_v45, -inf  ;;  %v1039_v55 = vsel %vm566_vm2, %v1017_v54, -inf }
 0x3c0   : > { %1019 = vmax.xlane.f32.xlu1 %v1018_v47  ;;  %v1036_v53 = vsel %vm566_vm2, %v1016_v51, -inf }
 0x3c1   : > { %1025 = vmax.xlane.f32.xlu0 %v1024_v49 }
 0x3c4   : > { %1028 = vmax.xlane.f32.xlu1 %v1027_v52 }
 0x3c5   : > { %1037 = vmax.xlane.f32.xlu0 %v1036_v53 }
 0x3c8   : > { %1040 = vmax.xlane.f32.xlu1 %v1039_v55 }
 0x43d   : > { %v1023_v56 = vpop.xlane.xlu0 %1022 }
 0x43e   : > { %v1043_v57 = vsub.f32 %v1011_v28, %v1023_v56 }
 0x440   : > { %v1052_v58 = vmul.f32 1.442695, %v1043_v57 }
 0x442   : > { %2514 = vpow2.f32 %v1052_v58 }
 0x449   : > { %v1035_v61 = vpop.xlane.xlu1 %1034 }
 0x44a   : > { %v1047_v62 = vsub.f32 %v1015_v37, %v1035_v61  ;;  %v1032_v63 = vpop.xlane.xlu0 %1031 }
 0x44b   : > { %v1046_v4 = vsub.f32 %v1014_v40, %v1032_v63 }
 0x44c   : > { %v3102_v2 = vpop.eup %2514  ;;  %v1060_v3 = vmul.f32 1.442695, %v1047_v62 }
 0x44d   : > { %v1020_v5 = vpop.xlane.xlu1 %1019  ;;  %v1069_v6 = vsel %vm566_vm2, %v3102_v2, 0.0  ;;  %v1058_v9 = vmul.f32 1.442695, %v1046_v4 }
 0x44e   : > { %2516 = vpow2.f32 %v1060_v3  ;;  %v1042_v7 = vsub.f32 %v1010_v44, %v1020_v5  ;;  %v1026_v8 = vpop.xlane.xlu0 %1025  ;;  %1070 = vadd.xlane.f32.xlu1 %v1069_v6 }
 0x44f   : > { %v1044_v11 = vsub.f32 %v1012_v46, %v1026_v8 }
 0x450   : > { %v1050_v10 = vmul.f32 1.442695, %v1042_v7 }
 0x451   : > { %v1029_v12 = vpop.xlane.xlu1 %1028  ;;  %v1054_v15 = vmul.f32 1.442695, %v1044_v11  ;;  %v1482_v11 = vld [vmem:[#allocation5] sm:$0xff] }
 0x452   : > { %2518 = vpow2.f32 %v1050_v10  ;;  %v1045_v13 = vsub.f32 %v1013_v50, %v1029_v12  ;;  %v1038_v14 = vpop.xlane.xlu0 %1037  ;;  %v1483_v12 = vld [vmem:[#allocation5 + $0x8] sm:$0xff] }
 0x453   : > { %2520 = vpow2.f32 %v1058_v9  ;;  %v1048_v17 = vsub.f32 %v1016_v51, %v1038_v14  ;;  %v2296_v14 = vpack.c.bf16 %v1483_v12, %v1482_v11  ;;  %v1600_v12 = vld [vmem:[%s3382_s3 + $0x10] sm:$0xff] }
 0x454   : > { %v1056_v16 = vmul.f32 1.442695, %v1045_v13  ;;  %v1484_v13 = vld [vmem:[#allocation5 + $0x10] sm:$0xff] }
 0x455   : > { %v1041_v18 = vpop.xlane.xlu1 %1040  ;;  %v1062_v21 = vmul.f32 1.442695, %v1048_v17  ;;  %v1486_v17 = vld [vmem:[#allocation5 + $0x20] sm:$0xff] }
 0x456   : > { %2522 = vpow2.f32 %v1056_v16  ;;  %v1049_v19 = vsub.f32 %v1017_v54, %v1041_v18  ;;  %v1487_v18 = vld [vmem:[#allocation5 + $0x28] sm:$0xff] }
 0x457   : > { %2524 = vpow2.f32 %v1054_v15  ;;  %v1485_v15 = vld [vmem:[#allocation5 + $0x18] sm:$0xff] }
 0x458   : > { %v3106_v20 = vpop.eup %2516  ;;  %v1064_v22 = vmul.f32 1.442695, %v1049_v19  ;;  %v2300_v16 = vpack.c.bf16 %v1485_v15, %v1484_v13  ;;  %v2304_v19 = vpack.c.bf16 %v1487_v18, %v1486_v17  ;;  %v1603_v13 = vld [vmem:[%s3382_s3 + $0x28] sm:$0xff] }
 0x459   : > { %v1081_v23 = vsel %vm566_vm2, %v3106_v20, 0.0 }
 0x45a   : > { %2526 = vpow2.f32 %v1064_v22  ;;  %1082 = vadd.xlane.f32.xlu1 %v1081_v23 }
 0x45b   : > { %2528 = vpow2.f32 %v1062_v21  ;;  %v1489_v21 = vld [vmem:[#allocation5 + $0x38] sm:$0xff] }
 0x45c   : > { %v2519_v24 = vpop.eup %2518 }
 0x45d   : > { %v1066_v26 = vsel %vm566_vm2, %v2519_v24, 0.0  ;;  %v2521_v27 = vpop.eup %2520 }
 0x45e   : > { %1067 = vadd.xlane.f32.xlu0 %v1066_v26  ;;  %v1078_v59 = vsel %vm566_vm2, %v2521_v27, 0.0 }
 0x460   : > { %v3111_v28 = vpop.eup %2522 }
 0x461   : > { %v1075_v29 = vsel %vm566_vm2, %v3111_v28, 0.0  ;;  %v2525_v30 = vpop.eup %2524 }
 0x462   : > { %1076 = vadd.xlane.f32.xlu1 %v1075_v29  ;;  %1079 = vadd.xlane.f32.xlu0 %v1078_v59  ;;  %v1072_v33 = vsel %vm566_vm2, %v2525_v30, 0.0 }
 0x464   : > { %v3116_v31 = vpop.eup %2526 }
 0x465   : > { %v1087_v32 = vsel %vm566_vm2, %v3116_v31, 0.0  ;;  %v2529_v34 = vpop.eup %2528 }
 0x466   : > { %1088 = vadd.xlane.f32.xlu1 %v1087_v32  ;;  %1073 = vadd.xlane.f32.xlu0 %v1072_v33  ;;  %v1084_v35 = vsel %vm566_vm2, %v2529_v34, 0.0 }
 0x46a   : > { %1085 = vadd.xlane.f32.xlu0 %v1084_v35 }
 0x477   : > { %2501 = vrot.lane.b32.xlu1 %v3003_v60, %s2701_s16  ;;  %s2713_s16 = smov 16  }
 0x47b   : > { %2506 = vrot.lane.b32.xlu1 %v3003_v60, %s2712_s18 }
 0x480   : > { %2496 = vrot.lane.b32.xlu0 %v3003_v60, %s2707_s10  ;;  %s2715_s10 = smov [#allocation7]  }
 0x481   : > { %s2628_s14 = sshll.u32 %s2715_s10, 4  ;;  %s2629_s14 = int_to_ptr.vmem [resolvable:$false] %s2628_s14 }
 0x4db   : > { %v1071_v36 = vpop.xlane.xlu1 %1070 }
 0x4dc   : > { %2530 = vrcp.f32 %v1071_v36 }
 0x4e6   : > { %v2531_v43 = vpop.eup %2530 }
 0x4e7   : > { %v1083_v37 = vpop.xlane.xlu1 %1082  ;;  %v1099_v60 = vmul.f32 %v2531_v43, %v3102_v2 }
 0x4eb   : > { %v1068_v38 = vpop.xlane.xlu0 %1067 }
 0x4ec   : > { %2532 = vrcp.f32 %v1068_v38 }
 0x4ed   : > { %2534 = vrcp.f32 %v1083_v37 }
 0x4ef   : > { %v1077_v39 = vpop.xlane.xlu1 %1076  ;;  %v1080_v40 = vpop.xlane.xlu0 %1079 }
 0x4f0   : > { %2536 = vrcp.f32 %v1080_v40 }
 0x4f1   : > { %2538 = vrcp.f32 %v1077_v39 }
 0x4f3   : > { %v1089_v41 = vpop.xlane.xlu1 %1088  ;;  %v1074_v42 = vpop.xlane.xlu0 %1073 }
 0x4f4   : > { %2540 = vrcp.f32 %v1074_v42 }
 0x4f6   : > { %v2533_v44 = vpop.eup %2532 }
 0x4f7   : > { %v2502_v45 = vpop.permute.xlu1 %2501  ;;  %v1086_v46 = vpop.xlane.xlu0 %1085  ;;  %v1098_v47 = vmul.f32 %v2533_v44, %v2519_v24 }
 0x4f8   : > { %v2504_v48 = vunpack.i.h.bf16 %v2502_v45  ;;  %v2503_v49 = vunpack.i.l.bf16 %v2502_v45  ;;  %2542 = vrcp.f32 %v1086_v46  ;;  %v2535_v50 = vpop.eup %2534 }
 0x4f9   : > { %2544 = vrcp.f32 %v1089_v41  ;;  %2178 = vmatprep.mubr.msk.f32.mxu0 %vm566_vm2, %v1098_v47  ;;  %v1103_v63 = vmul.f32 %v2535_v50, %v3106_v20  ;;  %v1488_v20 = vld [vmem:[#allocation5 + $0x30] sm:$0xff] }
 0x4fa   : > { %v2288_v51 = vpack.c.bf16 %v2504_v48, %v2503_v49  ;;  %2179 = vmatmul.mubr.msk.f32.vlgmr.msra.gmra.mrb[6].mxu0 %vm566_vm2, %v1099_v60  ;;  %v2537_v52 = vpop.eup %2536  ;;  %v2308_v23 = vpack.c.bf16 %v1489_v21, %v1488_v20 }
 0x4fb   : > { %v2507_v53 = vpop.permute.xlu1 %2506  ;;  %v2497_v54 = vpop.permute.xlu0 %2496  ;;  %v1102_v61 = vmul.f32 %v2537_v52, %v2521_v27  ;;  %v1601_v52 = vld [vmem:[%s3382_s3 + $0x18] sm:$0xff] }
 0x4fc   : > { %v2509_v55 = vunpack.i.h.bf16 %v2507_v53  ;;  %v2508_v56 = vunpack.i.l.bf16 %v2507_v53  ;;  %v2499_v57 = vunpack.i.h.bf16 %v2497_v54  ;;  %v2498_v58 = vunpack.i.l.bf16 %v2497_v54  ;;  %2289 = vmatprep.subr.bf16.mxu0 %v2288_v51  ;;  %v2539_v62 = vpop.eup %2538  ;;  %v1605_v54 = vld [vmem:[%s3382_s3 + $0x38] sm:$0xff] }
 0x4fd   : > { %2291 = vmatpush3.bf16.msra.mxu0 %v2288_v51  ;;  %2192 = vmatprep.mubr.msk.f32.mxu0 %vm566_vm2, %v1102_v61  ;;  %v1101_v7 = vmul.f32 %v2539_v62, %v3111_v28  ;;  %v1598_v51 = vld [vmem:[%s3382_s3] sm:$0xff]  ;;  %v1611_v62 = vld [vmem:[%s3382_s3 + $0x68] sm:$0xff] }
 0x4fe   : > { %v2284_v2 = vpack.c.bf16 %v2499_v57, %v2498_v58  ;;  %v2541_v3 = vpop.eup %2540  ;;  %v2292_v4 = vpack.c.bf16 %v2509_v55, %v2508_v56  ;;  %2297 = vmatprep.subr.bf16.mxu0 %v2296_v14  ;;  %v2314_v53 = vpack.c.bf16 %v1601_v52, %v1598_v51  ;;  %v1608_v55 = vld [vmem:[%s3382_s3 + $0x50] sm:$0xff]  ;;  %v1607_v58 = vld [vmem:[%s3382_s3 + $0x48] sm:$0xff]  ;;  %v1841_v52 = vld [vmem:[%s3383_s4 + $0x58] sm:$0xff] }
 0x4ff   : > { %v1100_v5 = vmul.f32 %v2541_v3, %v2525_v30  ;;  %v2316_v56 = vpack.c.bf16 %v1608_v55, %v1605_v54  ;;  %v1604_v57 = vld [vmem:[%s3382_s3 + $0x30] sm:$0xff]  ;;  %v1610_v3 = vld [vmem:[%s3382_s3 + $0x60] sm:$0xff]  ;;  %v1843_v55 = vld [vmem:[%s3383_s4 + $0x68] sm:$0xff] }
 0x500   : > { %2285 = vmatprep.subr.bf16.mxu1 %v2284_v2  ;;  %2193 = vmatmul.mubr.msk.f32.vlgmr.msra.gmra.mrb[8].mxu0 %vm566_vm2, %v1103_v63  ;;  %v2318_v61 = vpack.c.bf16 %v1607_v58, %v1604_v57  ;;  %v1614_v63 = vld [vmem:[%s3382_s3 + $0x80] sm:$0xff]  ;;  %v1840_v51 = vld [vmem:[%s3383_s4 + $0x50] sm:$0xff]  ;;  %v1845_v58 = vld [vmem:[%s3383_s4 + $0x78] sm:$0xff] }
 0x501   : > { %2287 = vmatpush3.bf16.msra.mxu1 %v2284_v2  ;;  %2185 = vmatprep.mubr.msk.f32.mxu1 %vm566_vm2, %v1100_v5  ;;  %v2320_v2 = vpack.c.bf16 %v1614_v63, %v1611_v62  ;;  %v1842_v54 = vld [vmem:[%s3383_s4 + $0x60] sm:$0xff]  ;;  %v1844_v57 = vld [vmem:[%s3383_s4 + $0x70] sm:$0xff]  ;;  %v1847_v63 = vld [vmem:[%s3383_s4 + $0x88] sm:$0xff] }
 0x502   : > { %v2543_v6 = vpop.eup %2542  ;;  %2293 = vmatprep.subr.bf16.mxu1 %v2292_v4  ;;  %2299 = vmatpush3.bf16.msra.mxu0 %v2296_v14  ;;  %v2328_v14 = vpack.c.bf16 %v1603_v13, %v1600_v12  ;;  %v1846_v62 = vld [vmem:[%s3383_s4 + $0x80] sm:$0xff]  ;;  %v1853_v12 = vld [vmem:[%s3383_s4 + $0xb8] sm:$0xff] }
 0x503   : > { %v2545_v8 = vpop.eup %2544  ;;  %v1104_v9 = vmul.f32 %v2543_v6, %v2529_v34  ;;  %2301 = vmatprep.subr.bf16.mxu0 %v2300_v16  ;;  %v1617_v6 = vld [vmem:[%s3382_s3 + $0x98] sm:$0xff] }
 0x504   : > { %2186 = vmatmul.mubr.msk.f32.vlgmr.msra.gmra.mrb[6].mxu1 %vm566_vm2, %v1101_v7  ;;  %v1105_v10 = vmul.f32 %v2545_v8, %v3116_v31  ;;  %v1620_v7 = vld [vmem:[%s3382_s3 + $0xb0] sm:$0xff] }
 0x505   : > { %2295 = vmatpush3.bf16.msra.mxu1 %v2292_v4  ;;  %2199 = vmatprep.mubr.msk.f32.mxu1 %vm566_vm2, %v1104_v9  ;;  %v1613_v4 = vld [vmem:[%s3382_s3 + $0x78] sm:$0xff]  ;;  %v2324_v8 = vpack.c.bf16 %v1620_v7, %v1617_v6  ;;  %v1616_v9 = vld [vmem:[%s3382_s3 + $0x90] sm:$0xff]  ;;  %v1851_v7 = vld [vmem:[%s3383_s4 + $0xa8] sm:$0xff] }
 0x506   : > { %2303 = vmatpush3.bf16.msra.mxu0 %v2300_v16  ;;  %v2322_v5 = vpack.c.bf16 %v1613_v4, %v1610_v3  ;;  %v1848_v3 = vld [vmem:[%s3383_s4 + $0x90] sm:$0xff]  ;;  %v1849_v4 = vld [vmem:[%s3383_s4 + $0x98] sm:$0xff] }
 0x507   : > { %2305 = vmatprep.subr.bf16.mxu0 %v2304_v19  ;;  %v2372_v6 = vpack.c.bf16 %v1849_v4, %v1848_v3 }
 0x508   : > { %2200 = vmatmul.mubr.msk.f32.vlgmr.msra.gmra.mrb[8].mxu1 %vm566_vm2, %v1105_v10  ;;  %v1619_v10 = vld [vmem:[%s3382_s3 + $0xa8] sm:$0xff] }
 0x509   : > { %v2326_v11 = vpack.c.bf16 %v1619_v10, %v1616_v9 }
 0x50a   : > { %2307 = vmatpush3.bf16.msra.mxu0 %v2304_v19 }
 0x50b   : > { %2309 = vmatprep.subr.bf16.mxu0 %v2308_v23 }
 0x50e   : > { %2311 = vmatpush3.bf16.msra.mxu0 %v2308_v23  ;;  %v2076_v23 = vld [vmem:[%s3385_s6] ss:$0 sm:$0xff] }
 0x5cd   : > { %v2180_v22 = vpop.f32.mrb[6].mxu0 }
 0x5ce   : > { %v1178_v24 = vpop.f32.mrb[7].mxu0 }
 0x5d3   : > { %v2194_v26 = vpop.f32.mrb[8].mxu0 }
 0x5d4   : > { %1462 = vrot.lane.b32.xlu1 %v2194_v26, %s2703_s20  ;;  %v1354_v27 = vpop.f32.mrb[9].mxu0  ;;  %v1609_v26 = vld [vmem:[%s3382_s3 + $0x58] sm:$0xff] }
 0x5d5   : > { %1460 = vrot.lane.b32.xlu0 %v1354_v27, %s2703_s20 }
 0x5d7   : > { %v2187_v28 = vpop.f32.mrb[6].mxu1 }
 0x5d8   : > { %1454 = vrot.lane.b32.xlu1 %v2187_v28, %s2713_s16  ;;  %v1267_v29 = vpop.f32.mrb[7].mxu1 }
 0x5d9   : > { %1452 = vrot.lane.b32.xlu0 %v1267_v29, %s2713_s16  ;;  %s2093_s16 = sshll.u32 %s2783_s9, 8 }
 0x5da   : > { %s3333_s25 = scalar_lea.hbm %s3387_s8, %s2093_s16 }
 0x5db   : > { %v2201_v59 = vpop.f32.mrb[8].mxu1 }
 0x5dc   : > { %1470 = vrot.lane.b32.xlu1 %v2201_v59, %s2709_s11  ;;  %v1441_v30 = vpop.f32.mrb[9].mxu1 }
 0x5dd   : > { %1468 = vrot.lane.b32.xlu0 %v1441_v30, %s2709_s11  ;;  %v1612_v30 = vld [vmem:[%s3382_s3 + $0x70] sm:$0xff]  ;;  %s2630_s11 = scalar_lea.vmem %s2629_s14, 512 }
 0x646   : > { %v1463_v31 = vpop.permute.xlu1 %1462 }
 0x647   : > { %v1461_v32 = vpop.permute.xlu0 %1460 }
 0x64a   : > { %v1455_v33 = vpop.permute.xlu1 %1454 }
 0x64b   : > { %v1453_v34 = vpop.permute.xlu0 %1452  ;;  %v1475_v36 = vsel %vm566_vm2, %v2180_v22, %v1455_v33 }
 0x64c   : > { %v1474_v35 = vsel %vm566_vm2, %v1178_v24, %v1453_v34  ;;  %v1478_v40 = vsel %vm1476_vm6, %v1475_v36, %v1463_v31  ;;  %v1606_v24 = vld [vmem:[%s3382_s3 + $0x40] sm:$0xff]  ;;  %v1615_v31 = vld [vmem:[%s3382_s3 + $0x88] sm:$0xff] }
 0x64d   : > { %v1477_v38 = vsel %vm1476_vm6, %v1474_v35, %v1461_v32  ;;  %v2332_v29 = vpack.c.bf16 %v1609_v26, %v1606_v24  ;;  %v2336_v33 = vpack.c.bf16 %v1615_v31, %v1612_v30  ;;  %v1618_v34 = vld [vmem:[%s3382_s3 + $0xa0] sm:$0xff]  ;;  %v1621_v35 = vld [vmem:[%s3382_s3 + $0xb8] sm:$0xff] }
 0x64e   : > { %v1471_v37 = vpop.permute.xlu1 %1470  ;;  %v2340_v36 = vpack.c.bf16 %v1621_v35, %v1618_v34 }
 0x64f   : > { %v1469_v39 = vpop.permute.xlu0 %1468  ;;  %v1481_v42 = vsel %vm1479_vm7, %v1478_v40, %v1471_v37  ;;  %v1831_v37 = vld [vmem:[%s3383_s4 + $0x8] sm:$0xff] }
 0x650   : > { %v1480_v41 = vsel %vm1479_vm7, %v1477_v38, %v1469_v39  ;;  %v1832_v38 = vld [vmem:[%s3383_s4 + $0x10] sm:$0xff]  ;;  %v2714_v39 = vmov 0.0|0.0  }
 0x651   : > { %2218 = vmatprep.mubr.msk.f32.mxu0 %vm344_vm0, %v1480_v41  ;;  %2344 = vmatprep.subr.bf16.mxu1 %v2714_v39  ;;  %v1833_v41 = vld [vmem:[%s3383_s4 + $0x18] sm:$0xff] }
 0x652   : > { %2219 = vmatmul.mubr.msk.f32.vlgmr.msra.gmra.mrb[10].mxu0 %vm344_vm0, %v1481_v42  ;;  %v2348_v42 = vpack.c.bf16 %v1833_v41, %v1832_v38 }
 0x653   : > { %1692 = vmatprep.mubr.f32.mxu0 %v2700_v25 }
 0x725   : > { %v2220_v43 = vpop.f32.mrb[10].mxu0 }
 0x726   : > { %v3149_v44 = vadd.f32 %v2220_v43, %v2923_v1  ;;  %v1562_v45 = vpop.f32.mrb[11].mxu0  ;;  %v1599_v1 = vld [vmem:[%s3382_s3 + $0x8] sm:$0xff]  ;;  %v1834_v43 = vld [vmem:[%s3383_s4 + $0x20] sm:$0xff] }
 0x727   : > { %v3152_v46 = vadd.f32 %v1562_v45, %v2921_v0  ;;  %v1602_v0 = vld [vmem:[%s3382_s3 + $0x20] sm:$0xff]  ;;  %v1835_v45 = vld [vmem:[%s3383_s4 + $0x28] sm:$0xff] }
 0x728   : > { %v1575_v47 = vmul.f32 %v3149_v44, %v3149_v44  ;;  %v2312_v50 = vpack.c.bf16 %v1602_v0, %v1599_v1  ;;  %v1838_v1 = vld [vmem:[%s3383_s4 + $0x40] sm:$0xff]  ;;  %v1839_v0 = vld [vmem:[%s3383_s4 + $0x48] sm:$0xff] }
 0x729   : > { %v1574_v60 = vmul.f32 %v3152_v46, %v3152_v46 }
 0x72a   : > { %v1579_v48 = vsel %vm344_vm0, %v1575_v47, 0.0  ;;  %2313 = vmatprep.subr.bf16.mxu0 %v2312_v50  ;;  %v2351_v47 = vpack.c.bf16 %v1835_v45, %v1834_v43  ;;  %v2357_v50 = vpack.c.bf16 %v1839_v0, %v1838_v1 }
 0x72b   : > { %1580 = vadd.xlane.f32.xlu1 %v1579_v48  ;;  %v1576_v49 = vsel %vm344_vm0, %v1574_v60, 0.0  ;;  %2315 = vmatpush1.bf16.msra.mxu0 %v2314_v53  ;;  %v1836_v60 = vld [vmem:[%s3383_s4 + $0x30] sm:$0xff]  ;;  %v1837_v48 = vld [vmem:[%s3383_s4 + $0x38] sm:$0xff]  ;;  %v2360_v53 = vpack.c.bf16 %v1841_v52, %v1840_v51 }
 0x72c   : > { %1577 = vadd.xlane.f32.xlu0 %v1576_v49  ;;  %2317 = vmatprep.subr.bf16.mxu0 %v2316_v56  ;;  %v2354_v49 = vpack.c.bf16 %v1837_v48, %v1836_v60  ;;  %v2363_v56 = vpack.c.bf16 %v1843_v55, %v1842_v54 }
 0x72f   : > { %2319 = vmatpush1.bf16.msra.mxu0 %v2318_v61  ;;  %v2366_v61 = vpack.c.bf16 %v1845_v58, %v1844_v57 }
 0x730   : > { %2321 = vmatprep.subr.bf16.mxu0 %v2320_v2  ;;  %v2369_v2 = vpack.c.bf16 %v1847_v63, %v1846_v62 }
 0x733   : > { %2323 = vmatpush1.bf16.msra.mxu0 %v2322_v5  ;;  %v1850_v5 = vld [vmem:[%s3383_s4 + $0xa0] sm:$0xff] }
 0x734   : > { %2325 = vmatprep.subr.bf16.mxu0 %v2324_v8  ;;  %v2375_v8 = vpack.c.bf16 %v1851_v7, %v1850_v5 }
 0x737   : > { %2327 = vmatpush1.bf16.msra.mxu0 %v2326_v11  ;;  %v1852_v11 = vld [vmem:[%s3383_s4 + $0xb0] sm:$0xff] }
 0x738   : > { %2329 = vmatprep.subr.bf16.mxu0 %v2328_v14 }
 0x7b8   : > { %v1581_v15 = vpop.xlane.xlu1 %1580 }
 0x7b9   : > { %v1583_v16 = vmul.f32 0.015625, %v1581_v15  ;;  %v1578_v17 = vpop.xlane.xlu0 %1577 }
 0x7ba   : > { %v1582_v18 = vmul.f32 0.015625, %v1578_v17 }
 0x7bb   : > { %v1585_v19 = vadd.f32 1e-05, %v1583_v16 }
 0x7bc   : > { %v1584_v20 = vadd.f32 1e-05, %v1582_v18 }
 0x7bd   : > { %2546 = vrsqrt.f32 %v1585_v19 }
 0x7be   : > { %2548 = vrsqrt.f32 %v1584_v20 }
 0x7c7   : > { %v2547_v21 = vpop.eup %2546 }
 0x7c8   : > { %v2549_v22 = vpop.eup %2548  ;;  %v1589_v59 = vmul.f32 %v2547_v21, %v3149_v44 }
 0x7c9   : > { %v1588_v27 = vmul.f32 %v2549_v22, %v3152_v46 }
 0x7ca   : > { %v1597_v32 = vmul.f32 %v2076_v23, %v1589_v59 }
 0x7cb   : > { %v1596_v28 = vmul.f32 %v2076_v23, %v1588_v27 }
 0x7cd   : > { %2077 = vmatmul.mubr.msk.f32.vlgmr.msra.gmra.mrb[12].mxu0 %vm344_vm0, %v1596_v28 }
 0x7ce   : > { %2331 = vmatpush3.bf16.msra.mxu0 %v2328_v14  ;;  %1698 = vmatprep.mubr.f32.mxu0 %v2700_v25  ;;  %v1830_v25 = vld [vmem:[%s3383_s4] sm:$0xff]  ;;  %v2378_v14 = vpack.c.bf16 %v1853_v12, %v1852_v11 }
 0x7cf   : > { %2333 = vmatprep.subr.bf16.mxu0 %v2332_v29  ;;  %v2345_v40 = vpack.c.bf16 %v1831_v37, %v1830_v25 }
 0x7d1   : > { %2078 = vmatmul.mubr.msk.f32.gmra.mrb[14].mxu0 %vm344_vm0, %v1597_v32  ;;  %2346 = vmatpush1.bf16.msra.mxu1 %v2345_v40 }
 0x7d2   : > { %2335 = vmatpush3.bf16.msra.mxu0 %v2332_v29  ;;  %2237 = vmatprep.mubr.msk.f32.mxu0 %vm344_vm0, %v1596_v28 }
 0x7d3   : > { %2337 = vmatprep.subr.bf16.mxu0 %v2336_v33  ;;  %2347 = vmatprep.subr.bf16.mxu1 %v2714_v39 }
 0x7d5   : > { %2349 = vmatpush1.bf16.msra.mxu1 %v2348_v42 }
 0x7d6   : > { %2339 = vmatpush3.bf16.msra.mxu0 %v2336_v33  ;;  %2350 = vmatprep.subr.bf16.mxu1 %v2714_v39 }
 0x7d7   : > { %2341 = vmatprep.subr.bf16.mxu0 %v2340_v36 }
 0x7d9   : > { %2352 = vmatpush1.bf16.msra.mxu1 %v2351_v47 }
 0x7da   : > { %2343 = vmatpush3.bf16.msra.mxu0 %v2340_v36  ;;  %2353 = vmatprep.subr.bf16.mxu1 %v2714_v39 }
 0x7dd   : > { %2238 = vmatmul.mubr.msk.f32.vlgmr.msra.gmra.mrb[16].mxu0 %vm344_vm0, %v1597_v32  ;;  %2355 = vmatpush1.bf16.msra.mxu1 %v2354_v49 }
 0x7de   : > { %2356 = vmatprep.subr.bf16.mxu1 %v2714_v39 }
 0x7e1   : > { %2358 = vmatpush1.bf16.msra.mxu1 %v2357_v50 }
 0x7e2   : > { %2359 = vmatprep.subr.bf16.mxu1 %v2714_v39 }
 0x7e5   : > { %2361 = vmatpush1.bf16.msra.mxu1 %v2360_v53 }
 0x7e6   : > { %2362 = vmatprep.subr.bf16.mxu1 %v2714_v39 }
 0x7e9   : > { %2364 = vmatpush1.bf16.msra.mxu1 %v2363_v56 }
 0x7ea   : > { %2365 = vmatprep.subr.bf16.mxu1 %v2714_v39 }
 0x7ed   : > { %2367 = vmatpush1.bf16.msra.mxu1 %v2366_v61 }
 0x7ee   : > { %2368 = vmatprep.subr.bf16.mxu1 %v2714_v39 }
 0x7f1   : > { %2370 = vmatpush1.bf16.msra.mxu1 %v2369_v2 }
 0x7f2   : > { %2371 = vmatprep.subr.bf16.mxu1 %v2714_v39 }
 0x7f5   : > { %2373 = vmatpush1.bf16.msra.mxu1 %v2372_v6 }
 0x7f6   : > { %2374 = vmatprep.subr.bf16.mxu1 %v2714_v39 }
 0x7f9   : > { %2376 = vmatpush1.bf16.msra.mxu1 %v2375_v8 }
 0x7fa   : > { %2377 = vmatprep.subr.bf16.mxu1 %v2714_v39 }
 0x7fd   : > { %2379 = vmatpush1.bf16.msra.mxu1 %v2378_v14 }
 0x8a0   : > { %v1694_v9 = vpop.f32.mrb[12].mxu0 }
 0x8a1   : > { %v1696_v10 = vpop.f32.mrb[13].mxu0  ;;  %v2081_v19 = vmul.f32 -1.442695, %v1694_v9 }
 0x8a2   : > { %1812 = vrot.lane.b32.xlu0 %v1696_v10, %s2702_s19  ;;  %v2082_v18 = vmul.f32 -1.442695, %v1696_v10 }
 0x8a4   : > { %v1700_v13 = vpop.f32.mrb[14].mxu0  ;;  %2550 = vpow2.f32 %v2082_v18 }
 0x8a5   : > { %v1702_v15 = vpop.f32.mrb[15].mxu0  ;;  %2552 = vpow2.f32 %v2081_v19  ;;  %v2083_v21 = vmul.f32 -1.442695, %v1700_v13 }
 0x8a6   : > { %1816 = vrot.lane.b32.xlu0 %v1702_v15, %s2702_s19  ;;  %v2084_v20 = vmul.f32 -1.442695, %v1702_v15 }
 0x8a8   : > { %2554 = vpow2.f32 %v2084_v20 }
 0x8a9   : > { %2556 = vpow2.f32 %v2083_v21 }
 0x8ae   : > { %v2551_v22 = vpop.eup %2550 }
 0x8af   : > { %v2553_v23 = vpop.eup %2552  ;;  %v1793_v24 = vadd.f32 1.0, %v2551_v22 }
 0x8b0   : > { %v2239_v16 = vpop.f32.mrb[16].mxu0  ;;  %v1792_v27 = vadd.f32 1.0, %v2553_v23 }
 0x8b1   : > { %v1771_v17 = vpop.f32.mrb[17].mxu0  ;;  %2558 = vrcp.f32 %v1793_v24 }
 0x8b2   : > { %1814 = vrot.lane.b32.xlu1 %v1771_v17, %s2702_s19  ;;  %v2555_v26 = vpop.eup %2554  ;;  %2560 = vrcp.f32 %v1792_v27 }
 0x8b3   : > { %v2557_v28 = vpop.eup %2556  ;;  %v1795_v29 = vadd.f32 1.0, %v2555_v26 }
 0x8b4   : > { %v1794_v59 = vadd.f32 1.0, %v2557_v28 }
 0x8b5   : > { %2562 = vrcp.f32 %v1795_v29 }
 0x8b6   : > { %1818 = vrot.lane.b32.xlu1 %v2239_v16, %s2702_s19  ;;  %2564 = vrcp.f32 %v1794_v59  ;;  %s338_s19 = scalar_lea.vmem [#allocation7], %s2044_s15  ;;  %s1940_s15 = scalar_lea.sflag [#allocation4], %s2907_s26 }
 0x8b7   : > { %s1953_s18 = sshll.u32 %s338_s19, 4  ;;  %s3327_s18 = int_to_ptr.vmem [resolvable:$true] %s1953_s18 }
 0x8b8   : > { %s2624_s9 = scalar_lea.vmem %s3327_s18, 256  ;;  %p2631_p10 = scmp.lt.s32.totalorder %s3327_s18, %s2629_s14 }
 0x8b9   : > { %p2625_p4 = scmp.ne.s32.totalorder %s3327_s18, %s2624_s9  ;;  %p2632_p13 = scmp.lt.s32.totalorder %s2630_s11, %s2624_s9 }
 0x8bb   : > { %v2559_v30 = vpop.eup %2558  ;;  %p2626_p6 = pnand %p2625_p4, %p2856_p12  ;;  %p2633_p3 = por %p2632_p13, %p2631_p10 }
 0x8bc   : > { %v2561_v31 = vpop.eup %2560  ;;  %v1805_v33 = vmul.f32 %v2559_v30, %v1696_v10 }
 0x8bd   : > { %v1804_v35 = vmul.f32 %v2561_v31, %v1694_v9  ;;  %p2627_p8 = pneg %p2626_p6 }
 0x8bf   : > { %v2563_v34 = vpop.eup %2562  ;;  %p2634_p7 = pnand %p2633_p3, %p2627_p8 }
 0x8c0   : > { %v2565_v25 = vpop.eup %2564  ;;  %v1807_v40 = vmul.f32 %v2563_v34, %v1702_v15 }
 0x8c1   : > { %v1806_v41 = vmul.f32 %v2565_v25, %v1700_v13 }
 0x914   : > { %v1813_v32 = vpop.permute.xlu0 %1812 }
 0x918   : > { %v1817_v42 = vpop.permute.xlu0 %1816 }
 0x924   : > { %v1815_v36 = vpop.permute.xlu1 %1814 }
 0x925   : > { %v1820_v37 = vsel %vm344_vm0, %v1813_v32, %v1815_v36  ;;  %v1827_v38 = vmul.f32 %v1815_v36, %v1805_v33 }
 0x926   : > { %v1826_v39 = vmul.f32 %v1820_v37, %v1804_v35 }
 0x927   : > { %2085 = vmatprep.mubr.msk.f32.mxu1 %vm344_vm0, %v1827_v38 }
 0x928   : > { %1925 = vmatmul.mubr.f32.vlgmr.msra.gmra.mrb[10].mxu1 %v1826_v39  ;;  %v1819_v43 = vpop.permute.xlu1 %1818 }
 0x929   : > { %v1821_v45 = vsel %vm344_vm0, %v1817_v42, %v1819_v43  ;;  %v1829_v47 = vmul.f32 %v1819_v43, %v1807_v40 }
 0x92a   : > { %v1828_v60 = vmul.f32 %v1821_v45, %v1806_v41 }
 0x92b   : > { %2086 = vmatprep.mubr.msk.f32.mxu1 %vm344_vm0, %v1829_v47 }
 0x92c   : > { %1930 = vmatmul.mubr.f32.gmra.mrb[12].mxu1 %v1828_v60 }
 0x9fb   : > { %v1926_v48 = vpop.f32.mrb[10].mxu1 }
 0x9fc   : > { %v1935_v49 = vadd.f32 %v1926_v48, %v3152_v46  ;;  %v1928_v1 = vpop.f32.mrb[11].mxu1 }
 0x9fe   : > { %1937 = vst.msk [vmem:[%s338_s19] sm:$0xff] %vm344_vm0, %v1935_v49 }
 0x9ff   : > { %v1931_v0 = vpop.f32.mrb[12].mxu1 }
 0xa00   : > { %v1936_v50 = vadd.f32 %v1931_v0, %v3149_v44  ;;  %v1933_v51 = vpop.f32.mrb[13].mxu1 }
 0xa02   : > { %1938 = vst.msk [vmem:[%s338_s19 + $0x8] sm:$0xff] %vm344_vm0, %v1936_v50 }
 0xa03   : > { %2637 = shalt.err (!%p2634_p7)
}
 0xa04   : > { %s2638_s13 = scalar_lea.hbm %s3333_s25, 256  ;;  %s2642_s16 = scalar_lea.hbm %s3387_s8, 512 }
 0xa05   : > { %p2639_p9 = scmp.ne.s32.totalorder %s3333_s25, %s2638_s13  ;;  %p2643_p5 = scmp.lt.u32.totalorder %s3333_s25, %s3387_s8 }
 0xa06   : > { %p2644_p11 = scmp.lt.u32.totalorder %s2642_s16, %s2638_s13  ;;  %p2646_p4 = scmp.lt.u32.totalorder %s2638_s13, %s3333_s25 }
 0xa07   : > { %p2640_p1 = pnand %p2639_p9, %p2856_p12 }
 0xa08   : > { %p2645_p2 = por %p2644_p11, %p2643_p5 }
 0xa09   : > { %p2641_p0 = pneg %p2640_p1 }
 0xa0a   : > { %p2647_p6 = por %p2646_p4, %p2645_p2 }
 0xa0c   : > { %p2648_p8 = pnand %p2647_p6, %p2641_p0 }
 0xa0e   : > { %2651 = shalt.err (!%p2648_p8)
}
 0xa0f   : > { %s2716_s9 = smov 128  }
 0xa10   : > { %2386 = dma.vmem_to_hbm [thread:$0]  (%p2856_p12), %s3327_s18, 256, %s3333_s25, %s1940_s15, %s2716_s9, %s2716_s9, %s2705_s17  }
 0xa11 PF: > { %s1968_s10 = sand.u32 1, %s2682_s27   ;;  %p3409_p10 = scmp.ne.s32.totalorder %s3395_s12, 0 }
 0xa12   : > { %p3410_p13 = scmp.ge.s32.totalorder %s2694_s30, 2  ;;  %s1969_s14 = scalar_lea.sflag [#allocation4], %s1968_s10 }
 0xa14   : > { %p2397_p3 = pnand %p3410_p13, %p3409_p10 }
 0xa16   : > { %2677 = dma.done.wait (!%p2397_p3), %s1969_s14, 256  }
 0xa17   : > { %2679 = vsyncadd (!%p2397_p3), %s1969_s14, 4294967040  ;;  %s3411_s30 = sld [smem:[#allocation11_spill]]  ;;  %s3412_s27 = smov %s2686_s28 }
 0xa18   : > { %s3413_s28 = smov %s2690_s29  ;;  %s3414_s29 = smov %s2852_s23 }
 0xa1d   : > { %p22_p7 = scmp.ge.s32.totalorder %s3411_s30, 4  }
 0xa1f   :  { %24 = sbr.rel (!%p22_p7) target bundleno = 6 (0x6), region = 101 }
 0xa26   :  { %1974 = vsyncpa [#allocation3], 1 }
 0xa27   :  { %1976 = vsyncpa [#allocation3 + $0x1], 1 }
 0xa28   :  { %1977 = vsyncpa [#allocation6], 1 }
 0xa29   :  { %1978 = vsyncpa [#allocation4], 1 }
 0xa2a   :  { %1980 = vsyncpa [#allocation4 + $0x1], 1 }

</bundles_post_ra>
